<compile_context>
chip_gen: v6e
topology: v6e:2x2x1
jax: 0.10.0
libtpu: 0.0.40
codegen_flags: <defaults>
</compile_context>

<pallas_src>
import functools

import jax
import jax.numpy as jnp
from jax.experimental import pallas as pl
from jax.experimental.pallas import tpu as pltpu


# ----------------------------------------------------------------------------
# helpers
# ----------------------------------------------------------------------------
def _round_up(x, m):
    return ((x + m - 1) // m) * m


def _pad2(w, rows, cols):
    return jnp.pad(w, ((0, rows - w.shape[0]), (0, cols - w.shape[1])))


def _fit_tile(total_units, req_units, cap=None):
    """Largest divisor of total_units that is <= min(req_units, cap)."""
    hi = total_units if cap is None else min(cap, total_units)
    hi = max(1, min(req_units, hi))
    for t in range(hi, 0, -1):
        if total_units % t == 0:
            return t
    return 1


def _vmem_cap_bytes():
    try:
        cap = int(pltpu.get_tpu_info().vmem_capacity_bytes)
    except Exception:
        cap = 64 << 20
    if cap <= (64 << 20):                      # v7x: leave scoped headroom below 64 MiB
        return 56 << 20
    return min(cap - (16 << 20), 112 << 20)    # v5e / v6e: use most of the 128 MiB


def _vmem_limit(streamed, resident, margin=8 << 20):
    # streamed blocks are double-buffered by the pipeline; residents/scratch are single.
    est = 2 * int(sum(streamed)) + int(sum(resident)) + int(margin)
    return int(min(est, _vmem_cap_bytes()))


# ----------------------------------------------------------------------------
# GCN layer 1:  h1 = relu(A_hat @ XW1 + b1)     (XW1 precomputed in the wrapper)
# grid = (Np // TM, Np // TK); TK sweep over the node axis is the reduction.
# ----------------------------------------------------------------------------
def _gcn_kernel(a_ref, xw_ref, b_ref, out_ref, acc_ref):
    k = pl.program_id(1)

    @pl.when(k == 0)
    def _():
        acc_ref[...] = jnp.zeros_like(acc_ref)

    acc_ref[...] += jnp.dot(a_ref[...], xw_ref[...],
                            preferred_element_type=jnp.float32)

    @pl.when(k == pl.num_programs(1) - 1)
    def _():
        out_ref[...] = jnp.maximum(acc_ref[...] + b_ref[...], 0.0).astype(out_ref.dtype)


def _gcn_layer(a, xw, b, *, tm, tk, out_dtype):
    n = a.shape[0]
    d = xw.shape[1]
    isz = a.dtype.itemsize
    xw_isz = xw.dtype.itemsize
    out_isz = jnp.dtype(out_dtype).itemsize

    grid = (n // tm, n // tk)
    streamed = (tm * tk * isz, tk * d * xw_isz, tm * d * out_isz)
    resident = (d * 4, tm * d * 4)
    cost = pl.CostEstimate(
        flops=int(2 * n * n * d),
        transcendentals=0,
        bytes_accessed=int(n * n * isz + grid[0] * n * d * xw_isz
                           + d * 4 + n * d * out_isz),
    )

    return pl.pallas_call(
        _gcn_kernel,
        out_shape=jax.ShapeDtypeStruct((n, d), out_dtype),
        grid_spec=pltpu.PrefetchScalarGridSpec(
            num_scalar_prefetch=0,
            grid=grid,
            in_specs=[
                # TODO(synk): sweep pipeline_mode=pl.Buffered(3) on the A spec if DMA
                # stays exposed at row-block boundaries (keep 2 on v7x if VMEM tight).
                pl.BlockSpec((tm, tk), lambda i, k: (i, k)),   # A_hat tile (streamed)
                pl.BlockSpec((tk, d), lambda i, k: (k, 0)),    # XW tile (streamed)
                pl.BlockSpec((1, d), lambda i, k: (0, 0)),     # b (pinned)
            ],
            out_specs=pl.BlockSpec((tm, d), lambda i, k: (i, 0)),
            scratch_shapes=[pltpu.VMEM((tm, d), jnp.float32)],
        ),
        compiler_params=pltpu.CompilerParams(
            dimension_semantics=("parallel", "arbitrary"),
            vmem_limit_bytes=_vmem_limit(streamed, resident),
        ),
        cost_estimate=cost,
    )(a, xw, b)


# ----------------------------------------------------------------------------
# GCN layer 2 fused with both projector heads (epilogue at k == last):
#   h  = relu(A_hat @ XW2 + b2)
#   p  = relu(h @ [Wi1||Wc1] + [bi1||bc1])              (one wide MXU matmul)
#   zc = p @ blockdiag(Wi2_pad, Wc2_pad) + [bi2_pad || bc2_pad(-1e30 pad)]
#   z  = L2normalize(zc[:, :ZP])          (rsqrt on EUP)
#   c  = softmax(zc[:, ZP:])              (approx reciprocal on EUP)
# All head output widths are 128-lane padded -> lane-dense unmasked stores.
# ----------------------------------------------------------------------------
def _gcn_proj_kernel(a_ref, xw_ref, b2_ref, w1_ref, b1_ref, w2_ref, bc_ref,
                     z_ref, c_ref, acc_ref, *, zp):
    k = pl.program_id(1)

    @pl.when(k == 0)
    def _():
        acc_ref[...] = jnp.zeros_like(acc_ref)

    acc_ref[...] += jnp.dot(a_ref[...], xw_ref[...],
                            preferred_element_type=jnp.float32)

    @pl.when(k == pl.num_programs(1) - 1)
    def _():
        cd = w1_ref.dtype
        h = jnp.maximum(acc_ref[...] + b2_ref[...], 0.0)                 # f32 (TM, H2P)
        p = jnp.dot(h.astype(cd), w1_ref[...],
                    preferred_element_type=jnp.float32) + b1_ref[...]
        p = jnp.maximum(p, 0.0)                                          # (TM, 2*PH)
        zc = jnp.dot(p.astype(cd), w2_ref[...],
                     preferred_element_type=jnp.float32) + bc_ref[...]   # (TM, ZP+CP)

        # instance head: L2 normalize (padded columns are exact zeros)
        zi = zc[:, :zp]
        sumsq = jnp.sum(zi * zi, axis=1, keepdims=True)
        z_ref[...] = (zi * jax.lax.rsqrt(jnp.maximum(sumsq, 1e-24))).astype(z_ref.dtype)

        # cluster head: softmax (padded columns carry -1e30 bias -> exp == 0)
        logits = zc[:, zp:]
        logits = logits - jnp.max(logits, axis=1, keepdims=True)
        e = jnp.exp(logits)
        inv_den = pl.reciprocal(jnp.sum(e, axis=1, keepdims=True), approx=True)
        c_ref[...] = (e * inv_den).astype(c_ref.dtype)


def _gcn_proj_layer(a, xw, b2, w1cat, b1cat, w2cat, b2cat, *, tm, tk, zp):
    n = a.shape[0]
    d = xw.shape[1]                 # H2P
    ph2 = w1cat.shape[1]            # 2 * prohid
    zc_w = w2cat.shape[1]           # ZP + CP
    cp = zc_w - zp
    isz = a.dtype.itemsize
    xw_isz = xw.dtype.itemsize
    w_isz = w1cat.dtype.itemsize

    grid = (n // tm, n // tk)
    streamed = (tm * tk * isz, tk * d * xw_isz, tm * zp * 4, tm * cp * 4)
    resident = (d * 4, d * ph2 * w_isz, ph2 * 4,
                ph2 * zc_w * w_isz, zc_w * 4, tm * d * 4)
    cost = pl.CostEstimate(
        flops=int(2 * n * n * d + 2 * n * d * ph2 + 2 * n * ph2 * zc_w),
        transcendentals=int(n * (cp + 2)),
        bytes_accessed=int(n * n * isz + grid[0] * n * d * xw_isz
                           + sum(resident[:-1]) + n * zc_w * 4),
    )

    return pl.pallas_call(
        functools.partial(_gcn_proj_kernel, zp=zp),
        out_shape=(jax.ShapeDtypeStruct((n, zp), jnp.float32),
                   jax.ShapeDtypeStruct((n, cp), jnp.float32)),
        grid_spec=pltpu.PrefetchScalarGridSpec(
            num_scalar_prefetch=0,
            grid=grid,
            in_specs=[
                pl.BlockSpec((tm, tk), lambda i, k: (i, k)),        # A_hat tile
                pl.BlockSpec((tk, d), lambda i, k: (k, 0)),         # XW2 tile
                pl.BlockSpec((1, d), lambda i, k: (0, 0)),          # b2 (pinned)
                pl.BlockSpec(w1cat.shape, lambda i, k: (0, 0)),     # [Wi1||Wc1] (pinned)
                pl.BlockSpec(b1cat.shape, lambda i, k: (0, 0)),
                pl.BlockSpec(w2cat.shape, lambda i, k: (0, 0)),     # blockdiag(Wi2,Wc2)
                pl.BlockSpec(b2cat.shape, lambda i, k: (0, 0)),
            ],
            out_specs=(pl.BlockSpec((tm, zp), lambda i, k: (i, 0)),
                       pl.BlockSpec((tm, cp), lambda i, k: (i, 0))),
            scratch_shapes=[pltpu.VMEM((tm, d), jnp.float32)],
        ),
        compiler_params=pltpu.CompilerParams(
            dimension_semantics=("parallel", "arbitrary"),
            vmem_limit_bytes=_vmem_limit(streamed, resident),
        ),
        cost_estimate=cost,
    )(a, xw, b2, w1cat, b1cat, w2cat, b2cat)


# ----------------------------------------------------------------------------
# Full forward
# ----------------------------------------------------------------------------
@functools.partial(jax.jit, static_argnames=("compute_dtype", "tm", "tk"))
def cc_forward(a_hat, x, params, *, compute_dtype=jnp.bfloat16, tm=512, tk=1024):
    """CC.forward: returns (z, c).  compute_dtype controls MXU-operand precision
    (bf16 default, f32 accumulation / epilogues always)."""
    n = a_hat.shape[0]
    cd = jnp.dtype(compute_dtype)
    hp = jax.lax.Precision.HIGHEST

    # ---- static feature-dim padding (lane-dense 128 multiples) -------------
    h1 = params["w1"].shape[1]          # 2*nhid
    h2 = params["w2"].shape[1]          # nhid
    ph = params["wi1"].shape[1]         # prohid
    zd = params["wi2"].shape[1]         # nhid (instance-head width)
    nc = params["wc2"].shape[1]         # nclass
    h1p, h2p = _round_up(h1, 128), _round_up(h2, 128)
    zp, cp = _round_up(zd, 128), _round_up(nc, 128)

    # ---- node-axis padding + tile fitting (no grid-collapsing fallback) ----
    n_pad = _round_up(n, 128)
    units = n_pad // 128
    tm_e = 128 * _fit_tile(units, max(1, tm // 128), cap=max(1, units // 2))
    tk_e = 128 * _fit_tile(units, max(1, tk // 128))

    # ---- padded / fused parameters -----------------------------------------
    w1p = _pad2(params["w1"], params["w1"].shape[0], h1p).astype(cd)
    b1p = _pad2(params["b1"], 1, h1p).astype(jnp.float32)
    w2p = _pad2(params["w2"], h1p, h2p).astype(cd)
    b2p = _pad2(params["b2"], 1, h2p).astype(jnp.float32)

    w1cat = _pad2(jnp.concatenate([params["wi1"], params["wc1"]], axis=1),
                  h2p, 2 * ph).astype(cd)
    b1cat = jnp.concatenate([params["bi1"], params["bc1"]], axis=1).astype(jnp.float32)

    w2cat = jnp.zeros((2 * ph, zp + cp), jnp.float32)
    w2cat = (w2cat.at[:ph, :zd].set(params["wi2"])
                  .at[ph:, zp:zp + nc].set(params["wc2"])).astype(cd)
    b2cat = jnp.concatenate(
        [_pad2(params["bi2"], 1, zp).astype(jnp.float32),
         jnp.full((1, cp), -1e30, jnp.float32).at[:, :nc].set(params["bc2"])],
        axis=1).astype(jnp.float32)

    # ---- pad A_hat / precompute XW1 (hoisted out of the GCN kernel) --------
    a_c = a_hat.astype(cd)
    xw1 = jnp.dot(x.astype(cd), w1p, precision=hp)
    if n_pad != n:
        a_c = jnp.pad(a_c, ((0, n_pad - n), (0, n_pad - n)))
        xw1 = jnp.pad(xw1, ((0, n_pad - n), (0, 0)))

    # ---- pass 1: h1 = relu(A_hat @ (x @ W1) + b1) ---------------------------
    h1_act = _gcn_layer(a_c, xw1, b1p, tm=tm_e, tk=tk_e, out_dtype=cd)

    # ---- pass 2 (+ fused projector epilogue) --------------------------------
    xw2 = jnp.dot(h1_act, w2p, precision=hp).astype(cd)
    z_pad, c_pad = _gcn_proj_layer(a_c, xw2, b2p, w1cat, b1cat, w2cat, b2cat,
                                   tm=tm_e, tk=tk_e, zp=zp)
    return z_pad[:n, :zd], c_pad[:n, :nc]


# ----------------------------------------------------------------------------
# Host-side glue: dense normalized adjacency, params, pure-JAX reference
# ----------------------------------------------------------------------------
def build_a_hat(edge_index, num_nodes):
    """Dense symmetric-normalized adjacency with self loops: D^-1/2 (A+I) D^-1/2."""
    a = jnp.zeros((num_nodes, num_nodes), jnp.float32)
    a = a.at[edge_index[0], edge_index[1]].set(1.0)
    idx = jnp.arange(num_nodes)
    a = a.at[idx, idx].set(1.0)
    deg = jnp.sum(a, axis=1)
    dinv = 1.0 / jnp.sqrt(jnp.maximum(deg, 1e-12))
    return a * dinv[:, None] * dinv[None, :]


def init_params(key, nfeat, nhid, prohid, nclass):
    """Deterministic glorot-style init. Weights are (in, out); biases are (1, out)."""
    def lin(k, fan_in, fan_out):
        kw, kb = jax.random.split(k)
        lim = 1.0 / jnp.sqrt(jnp.float32(fan_in))
        w = jax.random.uniform(kw, (fan_in, fan_out), jnp.float32, -lim, lim)
        b = jax.random.uniform(kb, (1, fan_out), jnp.float32, -lim, lim)
        return w, b

    ks = jax.random.split(key, 6)
    w1, b1 = lin(ks[0], nfeat, 2 * nhid)          # GCNConv 1
    w2, b2 = lin(ks[1], 2 * nhid, nhid)           # GCNConv 2
    wi1, bi1 = lin(ks[2], nhid, prohid)           # instance projector
    wi2, bi2 = lin(ks[3], prohid, nhid)
    wc1, bc1 = lin(ks[4], nhid, prohid)           # cluster projector
    wc2, bc2 = lin(ks[5], prohid, nclass)
    return dict(w1=w1, b1=b1, w2=w2, b2=b2,
                wi1=wi1, bi1=bi1, wi2=wi2, bi2=bi2,
                wc1=wc1, bc1=bc1, wc2=wc2, bc2=bc2)


def reference_forward(a_hat, x, p):
    hi = jax.lax.Precision.HIGHEST
    dot = functools.partial(jnp.dot, precision=hi)
    h = jnp.maximum(dot(a_hat, dot(x, p["w1"])) + p["b1"], 0.0)
    h = jnp.maximum(dot(a_hat, dot(h, p["w2"])) + p["b2"], 0.0)
    zi = dot(jnp.maximum(dot(h, p["wi1"]) + p["bi1"], 0.0), p["wi2"]) + p["bi2"]
    z = zi / jnp.maximum(jnp.linalg.norm(zi, axis=1, keepdims=True), 1e-12)
    cl = dot(jnp.maximum(dot(h, p["wc1"]) + p["bc1"], 0.0), p["wc2"]) + p["bc2"]
    c = jax.nn.softmax(cl, axis=1)
    return z, c


if __name__ == "__main__":
    # small shapes consistent with the module; N chosen to exercise the tiled grid
    N, NFEAT, NHID, PROHID, NCLASS = 256, 64, 32, 32, 8

    key = jax.random.PRNGKey(0)
    kx, kp, ke = jax.random.split(key, 3)

    x = jax.random.normal(kx, (N, NFEAT), jnp.float32)

    # undirected ring graph plus some random chords as edge_index (2, E)
    src = jnp.arange(N, dtype=jnp.int32)
    dst = (src + 1) % N
    cs = jax.random.randint(ke, (64,), 0, N, dtype=jnp.int32)
    cdst = jax.random.randint(jax.random.fold_in(ke, 1), (64,), 0, N, dtype=jnp.int32)
    edge_index = jnp.stack([jnp.concatenate([src, dst, cs, cdst]),
                            jnp.concatenate([dst, src, cdst, cs])], axis=0)

    a_hat = build_a_hat(edge_index, N)
    params = init_params(kp, NFEAT, NHID, PROHID, NCLASS)
    z_ref, c_ref = reference_forward(a_hat, x, params)

    # f32 MXU-operand path, explicit 2x2 grid (tm=tk=128): tight check on z; c is
    # slightly looser because the softmax denominator uses the EUP approx reciprocal.
    z, c = cc_forward(a_hat, x, params, compute_dtype=jnp.float32, tm=128, tk=128)
    jax.block_until_ready((z, c))
    assert z.shape == (N, NHID) and c.shape == (N, NCLASS)
    assert jnp.allclose(z, z_ref, atol=1e-5, rtol=1e-5), float(jnp.max(jnp.abs(z - z_ref)))
    assert jnp.allclose(c, c_ref, atol=1e-2, rtol=1e-2), float(jnp.max(jnp.abs(c - c_ref)))
    assert jnp.allclose(jnp.sum(c, axis=1), 1.0, atol=2e-2)

    # default path: bf16 MXU operands + auto-fitted (large) tiles: looser tolerance
    z16, c16 = cc_forward(a_hat, x, params)
    jax.block_until_ready((z16, c16))
    assert z16.shape == (N, NHID) and c16.shape == (N, NCLASS)
    assert bool(jnp.all(jnp.isfinite(z16))) and bool(jnp.all(jnp.isfinite(c16)))
    assert float(jnp.max(jnp.abs(z16 - z_ref))) < 1e-1
    assert float(jnp.max(jnp.abs(c16 - c_ref))) < 1e-1
    assert jnp.allclose(jnp.sum(c16, axis=1), 1.0, atol=2e-2)

    print("KERNEL_OK")
</pallas_src>

<mosaic_0001>
module attributes {stable_mosaic.version = 11 : i64} {
  func.func @_gcn_kernel(%arg0: i32, %arg1: i32, %arg2: memref<128x128xf32, #tpu.memory_space<vmem>>, %arg3: memref<128x128xf32, #tpu.memory_space<vmem>>, %arg4: memref<1x128xf32, #tpu.memory_space<vmem>>, %arg5: memref<128x128xf32, #tpu.memory_space<vmem>>, %arg6: memref<128x128xf32, #tpu.memory_space<vmem>>) attributes {dimension_semantics = [#tpu.dimension_semantics<parallel>, #tpu.dimension_semantics<arbitrary>], iteration_bounds = array<i64: 2, 2>, scalar_prefetch = 0 : i64, scratch_operands = 1 : i64, tpu.core_type = #tpu.core_type<tc>, window_params = [{transform_indices = @transform_0, window_bounds = array<i64: 128, 128>}, {transform_indices = @transform_1, window_bounds = array<i64: 128, 128>}, {pipeline_mode = #tpu.pipeline_mode<synchronous>, transform_indices = @transform_2, window_bounds = array<i64: 1, 128>}, {transform_indices = @transform_3, window_bounds = array<i64: 128, 128>}]} {
    %c0_i32 = arith.constant 0 : i32
    %0 = arith.cmpi eq, %arg1, %c0_i32 : i32
    %1 = arith.extui %0 : i1 to i32
    %c0_i32_0 = arith.constant 0 : i32
    %2 = arith.cmpi ne, %1, %c0_i32_0 : i32
    scf.if %2 {
      %cst_9 = arith.constant 0.000000e+00 : f32
      %12 = vector.broadcast %cst_9 : f32 to vector<128x128xf32>
      %c0_10 = arith.constant 0 : index
      %c0_11 = arith.constant 0 : index
      %13 = vector.load %arg6[%c0_10, %c0_11] : memref<128x128xf32, #tpu.memory_space<vmem>>, vector<128x128xf32>
      tpu.vector_store %arg6[%c0_10, %c0_11], %12 {strides = array<i32>} : memref<128x128xf32, #tpu.memory_space<vmem>>, vector<128x128xf32>,
    } else {
    }
    %c0 = arith.constant 0 : index
    %c0_1 = arith.constant 0 : index
    %3 = vector.load %arg6[%c0, %c0_1] : memref<128x128xf32, #tpu.memory_space<vmem>>, vector<128x128xf32>
    %c0_2 = arith.constant 0 : index
    %c0_3 = arith.constant 0 : index
    %4 = vector.load %arg2[%c0_2, %c0_3] : memref<128x128xf32, #tpu.memory_space<vmem>>, vector<128x128xf32>
    %c0_4 = arith.constant 0 : index
    %c0_5 = arith.constant 0 : index
    %5 = vector.load %arg3[%c0_4, %c0_5] : memref<128x128xf32, #tpu.memory_space<vmem>>, vector<128x128xf32>
    %cst = arith.constant dense<0.000000e+00> : vector<128x128xf32>
    %6 = tpu.matmul %4, %5, %cst {dimension_numbers = #tpu.dot_dimension_numbers<[1], [0], [0], [1], [0, 0, 1, 1], [], []>} : vector<128x128xf32>, vector<128x128xf32>, vector<128x128xf32> -> vector<128x128xf32>
    %7 = arith.addf %3, %6 : vector<128x128xf32>
    %c0_6 = arith.constant 0 : index
    %c0_7 = arith.constant 0 : index
    %8 = vector.load %arg6[%c0_6, %c0_7] : memref<128x128xf32, #tpu.memory_space<vmem>>, vector<128x128xf32>
    tpu.vector_store %arg6[%c0_6, %c0_7], %7 {strides = array<i32>} : memref<128x128xf32, #tpu.memory_space<vmem>>, vector<128x128xf32>,
    %c1_i32 = arith.constant 1 : i32
    %9 = arith.cmpi eq, %arg1, %c1_i32 : i32
    %10 = arith.extui %9 : i1 to i32
    %c0_i32_8 = arith.constant 0 : i32
    %11 = arith.cmpi ne, %10, %c0_i32_8 : i32
    scf.if %11 {
      %c0_9 = arith.constant 0 : index
      %c0_10 = arith.constant 0 : index
      %12 = vector.load %arg6[%c0_9, %c0_10] : memref<128x128xf32, #tpu.memory_space<vmem>>, vector<128x128xf32>
      %c0_11 = arith.constant 0 : index
      %c0_12 = arith.constant 0 : index
      %13 = vector.load %arg4[%c0_11, %c0_12] : memref<1x128xf32, #tpu.memory_space<vmem>>, vector<1x128xf32>
      %14 = vector.broadcast %13 : vector<1x128xf32> to vector<128x128xf32>
      %15 = arith.addf %12, %14 : vector<128x128xf32>
      %cst_13 = arith.constant 0.000000e+00 : f32
      %16 = vector.broadcast %cst_13 : f32 to vector<128x128xf32>
      %17 = arith.maximumf %15, %16 : vector<128x128xf32>
      %c0_14 = arith.constant 0 : index
      %c0_15 = arith.constant 0 : index
      %18 = vector.load %arg5[%c0_14, %c0_15] : memref<128x128xf32, #tpu.memory_space<vmem>>, vector<128x128xf32>
      tpu.vector_store %arg5[%c0_14, %c0_15], %17 {strides = array<i32>} : memref<128x128xf32, #tpu.memory_space<vmem>>, vector<128x128xf32>,
    } else {
    }
    return
  }
  func.func @transform_0(%arg0: i32, %arg1: i32) -> (i32, i32) {
    %c0_i32 = arith.constant 0 : i32
    return %arg0, %arg1 : i32, i32
  }
  func.func @transform_1(%arg0: i32, %arg1: i32) -> (i32, i32) {
    %c0_i32 = arith.constant 0 : i32
    %c0_i32_0 = arith.constant 0 : i32
    return %arg1, %c0_i32 : i32, i32
  }
  func.func @transform_2(%arg0: i32, %arg1: i32) -> (i32, i32) {
    %c0_i32 = arith.constant 0 : i32
    %c0_i32_0 = arith.constant 0 : i32
    %c0_i32_1 = arith.constant 0 : i32
    return %c0_i32, %c0_i32_0 : i32, i32
  }
  func.func @transform_3(%arg0: i32, %arg1: i32) -> (i32, i32) {
    %c0_i32 = arith.constant 0 : i32
    %c0_i32_0 = arith.constant 0 : i32
    return %arg0, %c0_i32 : i32, i32
  }
}

module attributes {stable_mosaic.version = 11 : i64} {
  func.func @_gcn_proj_kernel(%arg0: i32, %arg1: i32, %arg2: memref<128x128xf32, #tpu.memory_space<vmem>>, %arg3: memref<128x128xf32, #tpu.memory_space<vmem>>, %arg4: memref<1x128xf32, #tpu.memory_space<vmem>>, %arg5: memref<128x64xf32, #tpu.memory_space<vmem>>, %arg6: memref<1x64xf32, #tpu.memory_space<vmem>>, %arg7: memref<64x256xf32, #tpu.memory_space<vmem>>, %arg8: memref<1x256xf32, #tpu.memory_space<vmem>>, %arg9: memref<128x128xf32, #tpu.memory_space<vmem>>, %arg10: memref<128x128xf32, #tpu.memory_space<vmem>>, %arg11: memref<128x128xf32, #tpu.memory_space<vmem>>) attributes {dimension_semantics = [#tpu.dimension_semantics<parallel>, #tpu.dimension_semantics<arbitrary>], iteration_bounds = array<i64: 2, 2>, scalar_prefetch = 0 : i64, scratch_operands = 1 : i64, tpu.core_type = #tpu.core_type<tc>, window_params = [{transform_indices = @transform_0, window_bounds = array<i64: 128, 128>}, {transform_indices = @transform_1, window_bounds = array<i64: 128, 128>}, {pipeline_mode = #tpu.pipeline_mode<synchronous>, transform_indices = @transform_2, window_bounds = array<i64: 1, 128>}, {pipeline_mode = #tpu.pipeline_mode<synchronous>, transform_indices = @transform_3, window_bounds = array<i64: 128, 64>}, {pipeline_mode = #tpu.pipeline_mode<synchronous>, transform_indices = @transform_4, window_bounds = array<i64: 1, 64>}, {pipeline_mode = #tpu.pipeline_mode<synchronous>, transform_indices = @transform_5, window_bounds = array<i64: 64, 256>}, {pipeline_mode = #tpu.pipeline_mode<synchronous>, transform_indices = @transform_6, window_bounds = array<i64: 1, 256>}, {transform_indices = @transform_7, window_bounds = array<i64: 128, 128>}, {transform_indices = @transform_8, window_bounds = array<i64: 128, 128>}]} {
    %c0_i32 = arith.constant 0 : i32
    %0 = arith.cmpi eq, %arg1, %c0_i32 : i32
    %1 = arith.extui %0 : i1 to i32
    %c0_i32_0 = arith.constant 0 : i32
    %2 = arith.cmpi ne, %1, %c0_i32_0 : i32
    scf.if %2 {
      %cst_9 = arith.constant 0.000000e+00 : f32
      %12 = vector.broadcast %cst_9 : f32 to vector<128x128xf32>
      %c0_10 = arith.constant 0 : index
      %c0_11 = arith.constant 0 : index
      %13 = vector.load %arg11[%c0_10, %c0_11] : memref<128x128xf32, #tpu.memory_space<vmem>>, vector<128x128xf32>
      tpu.vector_store %arg11[%c0_10, %c0_11], %12 {strides = array<i32>} : memref<128x128xf32, #tpu.memory_space<vmem>>, vector<128x128xf32>,
    } else {
    }
    %c0 = arith.constant 0 : index
    %c0_1 = arith.constant 0 : index
    %3 = vector.load %arg11[%c0, %c0_1] : memref<128x128xf32, #tpu.memory_space<vmem>>, vector<128x128xf32>
    %c0_2 = arith.constant 0 : index
    %c0_3 = arith.constant 0 : index
    %4 = vector.load %arg2[%c0_2, %c0_3] : memref<128x128xf32, #tpu.memory_space<vmem>>, vector<128x128xf32>
    %c0_4 = arith.constant 0 : index
    %c0_5 = arith.constant 0 : index
    %5 = vector.load %arg3[%c0_4, %c0_5] : memref<128x128xf32, #tpu.memory_space<vmem>>, vector<128x128xf32>
    %cst = arith.constant dense<0.000000e+00> : vector<128x128xf32>
    %6 = tpu.matmul %4, %5, %cst {dimension_numbers = #tpu.dot_dimension_numbers<[1], [0], [0], [1], [0, 0, 1, 1], [], []>} : vector<128x128xf32>, vector<128x128xf32>, vector<128x128xf32> -> vector<128x128xf32>
    %7 = arith.addf %3, %6 : vector<128x128xf32>
    %c0_6 = arith.constant 0 : index
    %c0_7 = arith.constant 0 : index
    %8 = vector.load %arg11[%c0_6, %c0_7] : memref<128x128xf32, #tpu.memory_space<vmem>>, vector<128x128xf32>
    tpu.vector_store %arg11[%c0_6, %c0_7], %7 {strides = array<i32>} : memref<128x128xf32, #tpu.memory_space<vmem>>, vector<128x128xf32>,
    %c1_i32 = arith.constant 1 : i32
    %9 = arith.cmpi eq, %arg1, %c1_i32 : i32
    %10 = arith.extui %9 : i1 to i32
    %c0_i32_8 = arith.constant 0 : i32
    %11 = arith.cmpi ne, %10, %c0_i32_8 : i32
    scf.if %11 {
      %c0_9 = arith.constant 0 : index
      %c0_10 = arith.constant 0 : index
      %12 = vector.load %arg11[%c0_9, %c0_10] : memref<128x128xf32, #tpu.memory_space<vmem>>, vector<128x128xf32>
      %c0_11 = arith.constant 0 : index
      %c0_12 = arith.constant 0 : index
      %13 = vector.load %arg4[%c0_11, %c0_12] : memref<1x128xf32, #tpu.memory_space<vmem>>, vector<1x128xf32>
      %14 = vector.broadcast %13 : vector<1x128xf32> to vector<128x128xf32>
      %15 = arith.addf %12, %14 : vector<128x128xf32>
      %cst_13 = arith.constant 0.000000e+00 : f32
      %16 = vector.broadcast %cst_13 : f32 to vector<128x128xf32>
      %17 = arith.maximumf %15, %16 : vector<128x128xf32>
      %c0_14 = arith.constant 0 : index
      %c0_15 = arith.constant 0 : index
      %18 = vector.load %arg5[%c0_14, %c0_15] : memref<128x64xf32, #tpu.memory_space<vmem>>, vector<128x64xf32>
      %cst_16 = arith.constant dense<0.000000e+00> : vector<128x64xf32>
      %19 = tpu.matmul %17, %18, %cst_16 {dimension_numbers = #tpu.dot_dimension_numbers<[1], [0], [0], [1], [0, 0, 1, 1], [], []>} : vector<128x128xf32>, vector<128x64xf32>, vector<128x64xf32> -> vector<128x64xf32>
      %c0_17 = arith.constant 0 : index
      %c0_18 = arith.constant 0 : index
      %20 = vector.load %arg6[%c0_17, %c0_18] : memref<1x64xf32, #tpu.memory_space<vmem>>, vector<1x64xf32>
      %21 = vector.broadcast %20 : vector<1x64xf32> to vector<128x64xf32>
      %22 = arith.addf %19, %21 : vector<128x64xf32>
      %cst_19 = arith.constant 0.000000e+00 : f32
      %23 = vector.broadcast %cst_19 : f32 to vector<128x64xf32>
      %24 = arith.maximumf %22, %23 : vector<128x64xf32>
      %c0_20 = arith.constant 0 : index
      %c0_21 = arith.constant 0 : index
      %25 = vector.load %arg7[%c0_20, %c0_21] : memref<64x256xf32, #tpu.memory_space<vmem>>, vector<64x256xf32>
      %cst_22 = arith.constant dense<0.000000e+00> : vector<128x256xf32>
      %26 = tpu.matmul %24, %25, %cst_22 {dimension_numbers = #tpu.dot_dimension_numbers<[1], [0], [0], [1], [0, 0, 1, 1], [], []>} : vector<128x64xf32>, vector<64x256xf32>, vector<128x256xf32> -> vector<128x256xf32>
      %c0_23 = arith.constant 0 : index
      %c0_24 = arith.constant 0 : index
      %27 = vector.load %arg8[%c0_23, %c0_24] : memref<1x256xf32, #tpu.memory_space<vmem>>, vector<1x256xf32>
      %28 = vector.broadcast %27 : vector<1x256xf32> to vector<128x256xf32>
      %29 = arith.addf %26, %28 : vector<128x256xf32>
      %30 = vector.extract_strided_slice %29 {offsets = [0, 0], sizes = [128, 128], strides = [1, 1]} : vector<128x256xf32> to vector<128x128xf32>
      %31 = arith.mulf %30, %30 : vector<128x128xf32>
      %cst_25 = arith.constant dense<0.000000e+00> : vector<128xf32>
      %32 = vector.multi_reduction <add>, %31, %cst_25 [1] : vector<128x128xf32> to vector<128xf32>
      %33 = vector.shape_cast %32 : vector<128xf32> to vector<128x1xf32>
      %cst_26 = arith.constant 1.000000e-24 : f32
      %34 = vector.broadcast %cst_26 : f32 to vector<128x1xf32>
      %35 = arith.maximumf %33, %34 : vector<128x1xf32>
      %36 = math.rsqrt %35 : vector<128x1xf32>
      %37 = vector.broadcast %36 : vector<128x1xf32> to vector<128x128xf32>
      %38 = arith.mulf %30, %37 : vector<128x128xf32>
      %c0_27 = arith.constant 0 : index
      %c0_28 = arith.constant 0 : index
      %39 = vector.load %arg9[%c0_27, %c0_28] : memref<128x128xf32, #tpu.memory_space<vmem>>, vector<128x128xf32>
      tpu.vector_store %arg9[%c0_27, %c0_28], %38 {strides = array<i32>} : memref<128x128xf32, #tpu.memory_space<vmem>>, vector<128x128xf32>,
      %40 = vector.extract_strided_slice %29 {offsets = [0, 128], sizes = [128, 128], strides = [1, 1]} : vector<128x256xf32> to vector<128x128xf32>
      %cst_29 = arith.constant dense<0xFF800000> : vector<128xf32>
      %41 = vector.multi_reduction <maximumf>, %40, %cst_29 [1] : vector<128x128xf32> to vector<128xf32>
      %42 = vector.shape_cast %41 : vector<128xf32> to vector<128x1xf32>
      %43 = vector.broadcast %42 : vector<128x1xf32> to vector<128x128xf32>
      %44 = arith.subf %40, %43 : vector<128x128xf32>
      %45 = math.exp %44 : vector<128x128xf32>
      %cst_30 = arith.constant dense<0.000000e+00> : vector<128xf32>
      %46 = vector.multi_reduction <add>, %45, %cst_30 [1] : vector<128x128xf32> to vector<128xf32>
      %47 = vector.shape_cast %46 : vector<128xf32> to vector<128x1xf32>
      %48 = tpu.reciprocal %47 {approx = true} : vector<128x1xf32> -> vector<128x1xf32>
      %49 = vector.broadcast %48 : vector<128x1xf32> to vector<128x128xf32>
      %50 = arith.mulf %45, %49 : vector<128x128xf32>
      %c0_31 = arith.constant 0 : index
      %c0_32 = arith.constant 0 : index
      %51 = vector.load %arg10[%c0_31, %c0_32] : memref<128x128xf32, #tpu.memory_space<vmem>>, vector<128x128xf32>
      tpu.vector_store %arg10[%c0_31, %c0_32], %50 {strides = array<i32>} : memref<128x128xf32, #tpu.memory_space<vmem>>, vector<128x128xf32>,
    } else {
    }
    return
  }
  func.func @transform_0(%arg0: i32, %arg1: i32) -> (i32, i32) {
    %c0_i32 = arith.constant 0 : i32
    return %arg0, %arg1 : i32, i32
  }
  func.func @transform_1(%arg0: i32, %arg1: i32) -> (i32, i32) {
    %c0_i32 = arith.constant 0 : i32
    %c0_i32_0 = arith.constant 0 : i32
    return %arg1, %c0_i32 : i32, i32
  }
  func.func @transform_2(%arg0: i32, %arg1: i32) -> (i32, i32) {
    %c0_i32 = arith.constant 0 : i32
    %c0_i32_0 = arith.constant 0 : i32
    %c0_i32_1 = arith.constant 0 : i32
    return %c0_i32, %c0_i32_0 : i32, i32
  }
  func.func @transform_3(%arg0: i32, %arg1: i32) -> (i32, i32) {
    %c0_i32 = arith.constant 0 : i32
    %c0_i32_0 = arith.constant 0 : i32
    %c0_i32_1 = arith.constant 0 : i32
    return %c0_i32, %c0_i32_0 : i32, i32
  }
  func.func @transform_4(%arg0: i32, %arg1: i32) -> (i32, i32) {
    %c0_i32 = arith.constant 0 : i32
    %c0_i32_0 = arith.constant 0 : i32
    %c0_i32_1 = arith.constant 0 : i32
    return %c0_i32, %c0_i32_0 : i32, i32
  }
  func.func @transform_5(%arg0: i32, %arg1: i32) -> (i32, i32) {
    %c0_i32 = arith.constant 0 : i32
    %c0_i32_0 = arith.constant 0 : i32
    %c0_i32_1 = arith.constant 0 : i32
    return %c0_i32, %c0_i32_0 : i32, i32
  }
  func.func @transform_6(%arg0: i32, %arg1: i32) -> (i32, i32) {
    %c0_i32 = arith.constant 0 : i32
    %c0_i32_0 = arith.constant 0 : i32
    %c0_i32_1 = arith.constant 0 : i32
    return %c0_i32, %c0_i32_0 : i32, i32
  }
  func.func @transform_7(%arg0: i32, %arg1: i32) -> (i32, i32) {
    %c0_i32 = arith.constant 0 : i32
    %c0_i32_0 = arith.constant 0 : i32
    return %arg0, %c0_i32 : i32, i32
  }
  func.func @transform_8(%arg0: i32, %arg1: i32) -> (i32, i32) {
    %c0_i32 = arith.constant 0 : i32
    %c0_i32_0 = arith.constant 0 : i32
    return %arg0, %c0_i32 : i32, i32
  }
}

</mosaic_0001>

<bundles_post_ra>
// kernel: cc_forward.2
= control target key start
LH: loop header
LB: loop body
LE: loop exit
PB: predicated region body
PF: predicated region fallthrough
CT: control target
= control target key end

     0   :  { %s989_s12 = smov 0   ;;  %s991_s13 = smov 0   ;;  %s1158_s0 = inlined_call_operand.vmem [shape: f32[256,256], index: 0, kind: input, shape index: {}]   ;;  %s1159_s1 = inlined_call_operand.vmem [shape: f32[256,128], index: 1, kind: input, shape index: {}]   ;;  %s1160_s2 = inlined_call_operand.vmem [shape: f32[1,128], index: 2, kind: input, shape index: {}]   ;;  %s1161_s3 = inlined_call_operand.vmem [shape: f32[256,128], index: 3, kind: output, shape index: {}]  }
   0x1   :  { %s993_s14 = smov 0   ;;  %s995_s15 = smov 0  }
   0x2   :  { %s997_s16 = smov 0   ;;  %s999_s17 = smov 0  }
   0x3   :  { %s1001_s18 = smov 0  }
   0x4 LB: > { %s22_s19 = sadd.s32 1, %s958_s16  ;;  %s25_s20 = sadd.s32 1, %s962_s17  ;;  %s966_s18 = sphi %s1001_s18, %s13_s18   ;;  %s962_s17 = sphi %s999_s17, %s1167_s17   ;;  %s958_s16 = sphi %s997_s16, %s1166_s16   ;;  %s954_s15 = sphi %s995_s15, %s1165_s15   ;;  %s950_s14 = sphi %s993_s14, %s1164_s14   ;;  %s946_s13 = sphi %s991_s13, %s1163_s13   ;;  %s942_s12 = sphi %s989_s12, %s1162_s12  }
   0x5   : > { %p23_p0 = scmp.ge.s32.totalorder %s22_s19, 2  ;;  %p41_p1 = scmp.ne.s32.totalorder %s946_s13, %s942_s12 }
   0x6   : > { %p42_p2 = scmp.eq.s32.totalorder %s966_s18, 0  ;;  %s34_s24 = sadd.s32 1, %s946_s13 }
   0x7   : > { %s1169_s19 = smov (%p23_p0, %s22_s19), 0  ;;  %s1171_s20 = smov (!%p23_p0, %s25_s20), %s962_s17 }
   0x8   : > { %p43_p3 = por %p42_p2, %p41_p1  ;;  %p27_p4 = scmp.ge.s32.totalorder %s1171_s20, 2 }
   0x9   : > { %s30_s21 = ssub.s32 %s958_s16, %s1169_s19  ;;  %p718_p6 = scmp.ge.s32.totalorder %s966_s18, 4 }
   0xa   : > { %s1173_s20 = smov (%p27_p4, %s1171_s20), 0 }
   0xb   : > { %s29_s22 = ssub.s32 %s962_s17, %s1173_s20  ;;  %143 = sbr.rel (%p718_p6) target bundleno = 30 (0x1e), region = 20 }
   0xc   : > { %s31_s23 = sor.u32 %s30_s21, %s29_s22 }
   0xd   : > { %p32_p5 = scmp.eq.s32.totalorder %s31_s23, 0 }
   0xf   : > { %s1040_s25 = scalar_select %p32_p5, %s946_s13, %s34_s24  }
  0x10   : > { %146 = sbr.rel (!%p43_p3) target bundleno = 30 (0x1e), region = 24  ;;  %s148_s26 = sand.u32 (%p43_p3), 1, %s946_s13  }
  0x11   : > { %s734_s27 = sshll.u32 (%p43_p3), %s962_s17, 5  ;;  %s719_s28 = sshll.u32 (%p43_p3), %s148_s26, 7 }
  0x12   : > { %s153_s29 = sadd.s32 (%p43_p3), %s958_s16, %s734_s27  ;;  %s150_s7 = scalar_lea.vmem (%p43_p3), [#allocation3], %s719_s28 }
  0x13   : > { %s722_s30 = sshll.u32 (%p43_p3), %s153_s29, 3 }
  0x14   : > { %s1049_s6 = scalar_lea.vmem (%p43_p3), %s1158_s0, %s722_s30 }
  0x15   : > { %v214_v0 = vld [vmem:[%s1049_s6] sm:$0xff]  ;;  %v216_v1 = vld [vmem:[%s1049_s6 + $0x10] sm:$0xff] }
  0x16   : > { %v218_v2 = vld [vmem:[%s1049_s6 + $0x20] sm:$0xff]  ;;  %215 = vst [vmem:[%s150_s7] sm:$0xff] %v214_v0  ;;  %217 = vst [vmem:[%s150_s7 + $0x8] sm:$0xff] %v216_v1  ;;  %v220_v3 = vld [vmem:[%s1049_s6 + $0x30] sm:$0xff] }
  0x17   : > { %219 = vst [vmem:[%s150_s7 + $0x10] sm:$0xff] %v218_v2  ;;  %v222_v4 = vld [vmem:[%s1049_s6 + $0x40] sm:$0xff]  ;;  %v224_v5 = vld [vmem:[%s1049_s6 + $0x50] sm:$0xff]  ;;  %221 = vst [vmem:[%s150_s7 + $0x18] sm:$0xff] %v220_v3 }
  0x18   : > { %223 = vst [vmem:[%s150_s7 + $0x20] sm:$0xff] %v222_v4  ;;  %225 = vst [vmem:[%s150_s7 + $0x28] sm:$0xff] %v224_v5  ;;  %v226_v6 = vld [vmem:[%s1049_s6 + $0x60] sm:$0xff]  ;;  %v228_v7 = vld [vmem:[%s1049_s6 + $0x70] sm:$0xff] }
  0x19   : > { %v230_v8 = vld [vmem:[%s1049_s6 + $0x80] sm:$0xff]  ;;  %227 = vst [vmem:[%s150_s7 + $0x30] sm:$0xff] %v226_v6  ;;  %229 = vst [vmem:[%s150_s7 + $0x38] sm:$0xff] %v228_v7  ;;  %v232_v9 = vld [vmem:[%s1049_s6 + $0x90] sm:$0xff] }
  0x1a   : > { %231 = vst [vmem:[%s150_s7 + $0x40] sm:$0xff] %v230_v8  ;;  %v234_v10 = vld [vmem:[%s1049_s6 + $0xa0] sm:$0xff]  ;;  %v236_v11 = vld [vmem:[%s1049_s6 + $0xb0] sm:$0xff]  ;;  %233 = vst [vmem:[%s150_s7 + $0x48] sm:$0xff] %v232_v9 }
  0x1b   : > { %235 = vst [vmem:[%s150_s7 + $0x50] sm:$0xff] %v234_v10  ;;  %237 = vst [vmem:[%s150_s7 + $0x58] sm:$0xff] %v236_v11  ;;  %v238_v12 = vld [vmem:[%s1049_s6 + $0xc0] sm:$0xff]  ;;  %v240_v13 = vld [vmem:[%s1049_s6 + $0xd0] sm:$0xff] }
  0x1c   : > { %v242_v14 = vld [vmem:[%s1049_s6 + $0xe0] sm:$0xff]  ;;  %239 = vst [vmem:[%s150_s7 + $0x60] sm:$0xff] %v238_v12  ;;  %241 = vst [vmem:[%s150_s7 + $0x68] sm:$0xff] %v240_v13  ;;  %v244_v15 = vld [vmem:[%s1049_s6 + $0xf0] sm:$0xff] }
  0x1d   : > { %243 = vst [vmem:[%s150_s7 + $0x70] sm:$0xff] %v242_v14  ;;  %245 = vst [vmem:[%s150_s7 + $0x78] sm:$0xff] %v244_v15 }
  0x1e PF: > { %p723_p7 = scmp.ge.s32.totalorder %s966_s18, 1  ;;  %p259_p8 = scmp.lt.s32.totalorder %s966_s18, 5 }
  0x20   : > { %p260_p9 = pnand %p723_p7, %p259_p8 }
  0x21   : > { %s266_s8 = sand.u32 (!%p260_p9), 1, %s942_s12   ;;  %s725_s9 = sshll.u32 (!%p260_p9), %s950_s14, 4 }
  0x22   : > { %263 = sbr.rel (%p260_p9) target bundleno = 313 (0x139), region = 66  ;;  %s724_s10 = sshll.u32 (!%p260_p9), %s266_s8, 7 }
  0x23   : > { %p296_p10 = scmp.lt.s32.totalorder (!%p260_p9), %s725_s9, 31  ;;  %s727_s11 = sshll.u32 (!%p260_p9), %s954_s15, 4 }
  0x24   : > { %p302_p11 = scmp.lt.s32.totalorder (!%p260_p9), %s727_s11, 31  ;;  %s1082_s12 = scalar_lea.vmem (!%p260_p9), [#allocation3], %s724_s10 }
  0x25   : > { %p729_p12 = scmp.ne.s32.totalorder (!%p260_p9), %s950_s14, 0 }
  0x27   : > { %s1175_s9 = smov (!%p296_p10, %s725_s9), 31  ;;  %s1177_s11 = smov (!%p302_p11, %s727_s11), 31 }
  0x28   : > { %s726_s21 = sshll.u32 %s1175_s9, 3  ;;  %s728_s26 = sshll.u32 %s1177_s11, 3 }
  0x29   : > { %s1075_s24 = scalar_lea.vmem %s1159_s1, %s726_s21  ;;  %s1080_s29 = scalar_lea.vmem %s1161_s3, %s728_s26 }
  0x2a   : > { %310 = sbr.rel (%p729_p12) target bundleno = 56 (0x38), region = 74 }
  0x2f   : > { %v968_v16 = vmov 0.0  }
  0x30   : > { %311 = vst [vmem:[#allocation2 + $0x30] sm:$0xff] %v968_v16  ;;  %312 = vst [vmem:[#allocation2] sm:$0xff] %v968_v16 }
  0x31   : > { %313 = vst [vmem:[#allocation2 + $0x58] sm:$0xff] %v968_v16  ;;  %314 = vst [vmem:[#allocation2 + $0x18] sm:$0xff] %v968_v16 }
  0x32   : > { %315 = vst [vmem:[#allocation2 + $0x50] sm:$0xff] %v968_v16  ;;  %316 = vst [vmem:[#allocation2 + $0x68] sm:$0xff] %v968_v16 }
  0x33   : > { %317 = vst [vmem:[#allocation2 + $0x8] sm:$0xff] %v968_v16  ;;  %318 = vst [vmem:[#allocation2 + $0x48] sm:$0xff] %v968_v16 }
  0x34   : > { %319 = vst [vmem:[#allocation2 + $0x40] sm:$0xff] %v968_v16  ;;  %320 = vst [vmem:[#allocation2 + $0x20] sm:$0xff] %v968_v16 }
  0x35   : > { %321 = vst [vmem:[#allocation2 + $0x10] sm:$0xff] %v968_v16  ;;  %322 = vst [vmem:[#allocation2 + $0x38] sm:$0xff] %v968_v16 }
  0x36   : > { %323 = vst [vmem:[#allocation2 + $0x60] sm:$0xff] %v968_v16  ;;  %324 = vst [vmem:[#allocation2 + $0x70] sm:$0xff] %v968_v16 }
  0x37   : > { %325 = vst [vmem:[#allocation2 + $0x78] sm:$0xff] %v968_v16  ;;  %326 = vst [vmem:[#allocation2 + $0x28] sm:$0xff] %v968_v16 }
  0x38 PF: > { %v374_v17 = vld [vmem:[%s1075_s24 + $0x78] sm:$0xff]  ;;  %v373_v18 = vld [vmem:[%s1075_s24 + $0x70] sm:$0xff]  ;;  %v372_v19 = vld [vmem:[%s1075_s24 + $0x68] sm:$0xff]  ;;  %p730_p13 = scmp.ne.s32.totalorder %s950_s14, 1 }
  0x39   : > { %767 = vmatprep.subr.mxu0 %v374_v17  ;;  %823 = vmatprep.subr.mxu1 %v374_v17  ;;  %v371_v20 = vld [vmem:[%s1075_s24 + $0x60] sm:$0xff]  ;;  %v370_v21 = vld [vmem:[%s1075_s24 + $0x58] sm:$0xff]  ;;  %v369_v22 = vld [vmem:[%s1075_s24 + $0x50] sm:$0xff] }
  0x3a   : > { %768 = vmatpush3.msra.mxu0 %v374_v17  ;;  %839 = vmatpush3.msra.mxu1 %v374_v17  ;;  %v368_v23 = vld [vmem:[%s1075_s24 + $0x48] sm:$0xff]  ;;  %v367_v24 = vld [vmem:[%s1075_s24 + $0x40] sm:$0xff]  ;;  %v366_v25 = vld [vmem:[%s1075_s24 + $0x38] sm:$0xff] }
  0x3b   : > { %769 = vmatprep.subr.mxu0 %v373_v18  ;;  %824 = vmatprep.subr.mxu1 %v373_v18  ;;  %v365_v26 = vld [vmem:[%s1075_s24 + $0x30] sm:$0xff]  ;;  %v364_v27 = vld [vmem:[%s1075_s24 + $0x28] sm:$0xff]  ;;  %v363_v28 = vld [vmem:[%s1075_s24 + $0x20] sm:$0xff] }
  0x3c   : > { %770 = vmatpush3.msra.mxu0 %v373_v18  ;;  %840 = vmatpush3.msra.mxu1 %v373_v18  ;;  %v362_v29 = vld [vmem:[%s1075_s24 + $0x18] sm:$0xff]  ;;  %v361_v30 = vld [vmem:[%s1075_s24 + $0x10] sm:$0xff]  ;;  %v360_v31 = vld [vmem:[%s1075_s24 + $0x8] sm:$0xff] }
  0x3d   : > { %771 = vmatprep.subr.mxu0 %v372_v19  ;;  %825 = vmatprep.subr.mxu1 %v372_v19  ;;  %v359_v32 = vld [vmem:[%s1075_s24] sm:$0xff]  ;;  %v344_v35 = vld [vmem:[%s1082_s12 + $0x8] sm:$0xff]  ;;  %v345_v37 = vld [vmem:[%s1082_s12 + $0x10] sm:$0xff] }
  0x3e   : > { %772 = vmatpush3.msra.mxu0 %v372_v19  ;;  %841 = vmatpush3.msra.mxu1 %v372_v19  ;;  %v343_v33 = vld [vmem:[%s1082_s12] sm:$0xff]  ;;  %v352_v36 = vld [vmem:[%s1082_s12 + $0x48] sm:$0xff]  ;;  %v353_v38 = vld [vmem:[%s1082_s12 + $0x50] sm:$0xff] }
  0x3f   : > { %773 = vmatprep.subr.mxu0 %v371_v20  ;;  %826 = vmatprep.subr.mxu1 %v371_v20  ;;  %v351_v34 = vld [vmem:[%s1082_s12 + $0x40] sm:$0xff]  ;;  %v346_v39 = vld [vmem:[%s1082_s12 + $0x18] sm:$0xff]  ;;  %v348_v43 = vld [vmem:[%s1082_s12 + $0x28] sm:$0xff] }
  0x40   : > { %774 = vmatpush3.msra.mxu0 %v371_v20  ;;  %842 = vmatpush3.msra.mxu1 %v371_v20  ;;  %v354_v40 = vld [vmem:[%s1082_s12 + $0x58] sm:$0xff]  ;;  %v347_v41 = vld [vmem:[%s1082_s12 + $0x20] sm:$0xff]  ;;  %v356_v44 = vld [vmem:[%s1082_s12 + $0x68] sm:$0xff] }
  0x41   : > { %775 = vmatprep.subr.mxu0 %v370_v21  ;;  %827 = vmatprep.subr.mxu1 %v370_v21  ;;  %v355_v42 = vld [vmem:[%s1082_s12 + $0x60] sm:$0xff]  ;;  %v349_v45 = vld [vmem:[%s1082_s12 + $0x30] sm:$0xff]  ;;  %v350_v47 = vld [vmem:[%s1082_s12 + $0x38] sm:$0xff] }
  0x42   : > { %776 = vmatpush3.msra.mxu0 %v370_v21  ;;  %843 = vmatpush3.msra.mxu1 %v370_v21  ;;  %v357_v46 = vld [vmem:[%s1082_s12 + $0x70] sm:$0xff]  ;;  %v358_v48 = vld [vmem:[%s1082_s12 + $0x78] sm:$0xff]  ;;  %v328_v49 = vld [vmem:[#allocation2] sm:$0xff] }
  0x43   : > { %777 = vmatprep.subr.mxu0 %v369_v22  ;;  %828 = vmatprep.subr.mxu1 %v369_v22  ;;  %v336_v50 = vld [vmem:[#allocation2 + $0x20] sm:$0xff]  ;;  %v327_v53 = vld [vmem:[#allocation2 + $0x30] sm:$0xff]  ;;  %v330_v59 = vld [vmem:[#allocation2 + $0x18] sm:$0xff] }
  0x44   : > { %778 = vmatpush3.msra.mxu0 %v369_v22  ;;  %844 = vmatpush3.msra.mxu1 %v369_v22  ;;  %v335_v54 = vld [vmem:[#allocation2 + $0x40] sm:$0xff]  ;;  %v338_v60 = vld [vmem:[#allocation2 + $0x38] sm:$0xff]  ;;  %v337_v2 = vld [vmem:[#allocation2 + $0x10] sm:$0xff] }
  0x45   : > { %779 = vmatprep.subr.mxu0 %v368_v23  ;;  %829 = vmatprep.subr.mxu1 %v368_v23  ;;  %v329_v1 = vld [vmem:[#allocation2 + $0x58] sm:$0xff]  ;;  %v332_v7 = vld [vmem:[#allocation2 + $0x68] sm:$0xff]  ;;  %v340_v8 = vld [vmem:[#allocation2 + $0x70] sm:$0xff] }
  0x46   : > { %780 = vmatpush3.msra.mxu0 %v368_v23  ;;  %845 = vmatpush3.msra.mxu1 %v368_v23  ;;  %v331_v13 = vld [vmem:[#allocation2 + $0x50] sm:$0xff]  ;;  %v339_v14 = vld [vmem:[#allocation2 + $0x60] sm:$0xff]  ;;  %v334_v19 = vld [vmem:[#allocation2 + $0x48] sm:$0xff] }
  0x47   : > { %781 = vmatprep.subr.mxu0 %v367_v24  ;;  %830 = vmatprep.subr.mxu1 %v367_v24  ;;  %v342_v20 = vld [vmem:[#allocation2 + $0x28] sm:$0xff] }
  0x48   : > { %782 = vmatpush3.msra.mxu0 %v367_v24  ;;  %846 = vmatpush3.msra.mxu1 %v367_v24 }
  0x49   : > { %783 = vmatprep.subr.mxu0 %v366_v25  ;;  %831 = vmatprep.subr.mxu1 %v366_v25 }
  0x4a   : > { %784 = vmatpush3.msra.mxu0 %v366_v25  ;;  %847 = vmatpush3.msra.mxu1 %v366_v25  ;;  %v333_v25 = vld [vmem:[#allocation2 + $0x8] sm:$0xff] }
  0x4b   : > { %785 = vmatprep.subr.mxu0 %v365_v26  ;;  %832 = vmatprep.subr.mxu1 %v365_v26 }
  0x4c   : > { %786 = vmatpush3.msra.mxu0 %v365_v26  ;;  %848 = vmatpush3.msra.mxu1 %v365_v26  ;;  %v341_v26 = vld [vmem:[#allocation2 + $0x78] sm:$0xff] }
  0x4d   : > { %787 = vmatprep.subr.mxu0 %v364_v27  ;;  %833 = vmatprep.subr.mxu1 %v364_v27 }
  0x4e   : > { %788 = vmatpush3.msra.mxu0 %v364_v27  ;;  %849 = vmatpush3.msra.mxu1 %v364_v27 }
  0x4f   : > { %789 = vmatprep.subr.mxu0 %v363_v28  ;;  %834 = vmatprep.subr.mxu1 %v363_v28 }
  0x50   : > { %790 = vmatpush3.msra.mxu0 %v363_v28  ;;  %850 = vmatpush3.msra.mxu1 %v363_v28 }
  0x51   : > { %791 = vmatprep.subr.mxu0 %v362_v29  ;;  %835 = vmatprep.subr.mxu1 %v362_v29 }
  0x52   : > { %792 = vmatpush3.msra.mxu0 %v362_v29  ;;  %851 = vmatpush3.msra.mxu1 %v362_v29 }
  0x53   : > { %793 = vmatprep.subr.mxu0 %v361_v30  ;;  %836 = vmatprep.subr.mxu1 %v361_v30 }
  0x54   : > { %794 = vmatpush3.msra.mxu0 %v361_v30  ;;  %852 = vmatpush3.msra.mxu1 %v361_v30 }
  0x55   : > { %795 = vmatprep.subr.mxu0 %v360_v31  ;;  %837 = vmatprep.subr.mxu1 %v360_v31 }
  0x56   : > { %796 = vmatpush3.msra.mxu0 %v360_v31  ;;  %853 = vmatpush3.msra.mxu1 %v360_v31 }
  0x57   : > { %797 = vmatprep.subr.mxu0 %v359_v32  ;;  %838 = vmatprep.subr.mxu1 %v359_v32 }
  0x58   : > { %798 = vmatpush3.msra.mxu0 %v359_v32  ;;  %854 = vmatpush3.msra.mxu1 %v359_v32 }
  0x59   : > { %799 = vmatprep.mubr.f32.mxu0 %v343_v33  ;;  %811 = vmatprep.mubr.f32.mxu1 %v351_v34 }
  0x5a   : > { %800 = vmatmul.mubr.f32.vlgmr.msra.gmra.mxu0 %v344_v35  ;;  %812 = vmatmul.mubr.f32.vlgmr.msra.gmra.mxu1 %v352_v36 }
  0x5b   : > { %802 = vmatprep.mubr.f32.mxu0 %v345_v37  ;;  %814 = vmatprep.mubr.f32.mxu1 %v353_v38 }
  0x5e   : > { %803 = vmatmul.mubr.f32.gmra.mxu0 %v346_v39  ;;  %815 = vmatmul.mubr.f32.gmra.mxu1 %v354_v40 }
  0x5f   : > { %805 = vmatprep.mubr.f32.mxu0 %v347_v41  ;;  %817 = vmatprep.mubr.f32.mxu1 %v355_v42 }
  0x62   : > { %806 = vmatmul.mubr.f32.gmra.mxu0 %v348_v43  ;;  %818 = vmatmul.mubr.f32.gmra.mxu1 %v356_v44 }
  0x63   : > { %808 = vmatprep.mubr.f32.mxu0 %v349_v45  ;;  %820 = vmatprep.mubr.f32.mxu1 %v357_v46 }
  0x66   : > { %809 = vmatmul.mubr.f32.gmra.mxu0 %v350_v47  ;;  %821 = vmatmul.mubr.f32.gmra.mxu1 %v358_v48 }
 0x11a   : > { %v801_v51 = vpop.f32.mrf.mxu0  ;;  %v813_v52 = vpop.f32.mrf.mxu1 }
 0x11b   : > { %v521_v55 = vadd.f32 %v801_v51, %v328_v49  ;;  %v529_v56 = vadd.f32 %v813_v52, %v336_v50 }
 0x11c   : > { %v441_v57 = vpop.f32.mrf.mxu0  ;;  %v481_v58 = vpop.f32.mrf.mxu1 }
 0x11d   : > { %537 = vst [vmem:[#allocation2] sm:$0xff] %v521_v55  ;;  %545 = vst [vmem:[#allocation2 + $0x20] sm:$0xff] %v529_v56  ;;  %v520_v61 = vadd.f32 %v441_v57, %v327_v53  ;;  %v528_v62 = vadd.f32 %v481_v58, %v335_v54 }
 0x11e   : > { %v804_v63 = vpop.f32.mrf.mxu0  ;;  %v816_v0 = vpop.f32.mrf.mxu1 }
 0x11f   : > { %536 = vst [vmem:[#allocation2 + $0x30] sm:$0xff] %v520_v61  ;;  %544 = vst [vmem:[#allocation2 + $0x40] sm:$0xff] %v528_v62  ;;  %v523_v3 = vadd.f32 %v804_v63, %v330_v59  ;;  %v531_v4 = vadd.f32 %v816_v0, %v338_v60 }
 0x120   : > { %v451_v5 = vpop.f32.mrf.mxu0  ;;  %v491_v6 = vpop.f32.mrf.mxu1 }
 0x121   : > { %539 = vst [vmem:[#allocation2 + $0x18] sm:$0xff] %v523_v3  ;;  %547 = vst [vmem:[#allocation2 + $0x38] sm:$0xff] %v531_v4  ;;  %v522_v9 = vadd.f32 %v451_v5, %v329_v1  ;;  %v530_v10 = vadd.f32 %v491_v6, %v337_v2 }
 0x122   : > { %v807_v11 = vpop.f32.mrf.mxu0  ;;  %v819_v12 = vpop.f32.mrf.mxu1 }
 0x123   : > { %538 = vst [vmem:[#allocation2 + $0x58] sm:$0xff] %v522_v9  ;;  %546 = vst [vmem:[#allocation2 + $0x10] sm:$0xff] %v530_v10  ;;  %v525_v15 = vadd.f32 %v807_v11, %v332_v7  ;;  %v533_v16 = vadd.f32 %v819_v12, %v340_v8 }
 0x124   : > { %v461_v17 = vpop.f32.mrf.mxu0  ;;  %v501_v18 = vpop.f32.mrf.mxu1 }
 0x125   : > { %541 = vst [vmem:[#allocation2 + $0x68] sm:$0xff] %v525_v15  ;;  %549 = vst [vmem:[#allocation2 + $0x70] sm:$0xff] %v533_v16  ;;  %v524_v21 = vadd.f32 %v461_v17, %v331_v13  ;;  %v532_v22 = vadd.f32 %v501_v18, %v339_v14 }
 0x126   : > { %v810_v23 = vpop.f32.mrf.mxu0  ;;  %v822_v24 = vpop.f32.mrf.mxu1 }
 0x127   : > { %540 = vst [vmem:[#allocation2 + $0x50] sm:$0xff] %v524_v21  ;;  %548 = vst [vmem:[#allocation2 + $0x60] sm:$0xff] %v532_v22  ;;  %v527_v27 = vadd.f32 %v810_v23, %v334_v19  ;;  %v535_v28 = vadd.f32 %v822_v24, %v342_v20  ;;  %555 = sbr.rel (%p730_p13) target bundleno = 313 (0x139), region = 78 }
 0x128   : > { %v471_v29 = vpop.f32.mrf.mxu0  ;;  %v511_v30 = vpop.f32.mrf.mxu1 }
 0x129   : > { %543 = vst [vmem:[#allocation2 + $0x48] sm:$0xff] %v527_v27  ;;  %551 = vst [vmem:[#allocation2 + $0x28] sm:$0xff] %v535_v28  ;;  %v526_v31 = vadd.f32 %v471_v29, %v333_v25  ;;  %v534_v32 = vadd.f32 %v511_v30, %v341_v26 }
 0x12b   : > { %542 = vst [vmem:[#allocation2 + $0x8] sm:$0xff] %v526_v31  ;;  %550 = vst [vmem:[#allocation2 + $0x78] sm:$0xff] %v534_v32 }
 0x12c   : > { %v556_v33 = vld [vmem:[#allocation2 + $0x30] sm:$0xff]  ;;  %v731_v34 = vld [vmem:[%s1160_s2] ss:$0 sm:$0xff]  ;;  %v558_v38 = vld [vmem:[#allocation2 + $0x58] sm:$0xff] }
 0x12d   : > { %v557_v35 = vld [vmem:[#allocation2] sm:$0xff]  ;;  %v579_v36 = vadd.f32 %v731_v34, %v556_v33  ;;  %v559_v39 = vld [vmem:[#allocation2 + $0x18] sm:$0xff]  ;;  %v581_v41 = vadd.f32 %v731_v34, %v558_v38  ;;  %v561_v44 = vld [vmem:[#allocation2 + $0x68] sm:$0xff] }
 0x12e   : > { %v580_v37 = vadd.f32 %v731_v34, %v557_v35  ;;  %v560_v40 = vld [vmem:[#allocation2 + $0x50] sm:$0xff]  ;;  %v582_v42 = vadd.f32 %v731_v34, %v559_v39  ;;  %v584_v49 = vadd.f32 %v731_v34, %v561_v44  ;;  %v564_v51 = vld [vmem:[#allocation2 + $0x40] sm:$0xff]  ;;  %v567_v58 = vld [vmem:[#allocation2 + $0x38] sm:$0xff] }
 0x12f   : > { %v583_v43 = vadd.f32 %v731_v34, %v560_v40  ;;  %v595_v47 = vmax.f32 %v579_v36, 0.0  ;;  %v565_v52 = vld [vmem:[#allocation2 + $0x20] sm:$0xff]  ;;  %v566_v53 = vld [vmem:[#allocation2 + $0x10] sm:$0xff]  ;;  %v597_v54 = vmax.f32 %v581_v41, 0.0  ;;  %v587_v63 = vadd.f32 %v731_v34, %v564_v51 }
 0x130   : > { %v563_v46 = vld [vmem:[#allocation2 + $0x48] sm:$0xff]  ;;  %v596_v48 = vmax.f32 %v580_v37, 0.0  ;;  %v598_v55 = vmax.f32 %v582_v42, 0.0  ;;  %v568_v59 = vld [vmem:[#allocation2 + $0x60] sm:$0xff]  ;;  %v569_v60 = vld [vmem:[#allocation2 + $0x70] sm:$0xff]  ;;  %v600_v61 = vmax.f32 %v584_v49, 0.0  ;;  %v588_v0 = vadd.f32 %v731_v34, %v565_v52 }
 0x131   : > { %v599_v56 = vmax.f32 %v583_v43, 0.0  ;;  %v586_v57 = vadd.f32 %v731_v34, %v563_v46  ;;  %611 = vst [vmem:[%s1080_s29] sm:$0xff] %v595_v47  ;;  %v571_v2 = vld [vmem:[#allocation2 + $0x28] sm:$0xff]  ;;  %613 = vst [vmem:[%s1080_s29 + $0x10] sm:$0xff] %v597_v54  ;;  %v589_v4 = vadd.f32 %v731_v34, %v566_v53  ;;  %v590_v5 = vadd.f32 %v731_v34, %v567_v58 }
 0x132   : > { %v562_v45 = vld [vmem:[#allocation2 + $0x8] sm:$0xff]  ;;  %612 = vst [vmem:[%s1080_s29 + $0x8] sm:$0xff] %v596_v48  ;;  %v570_v1 = vld [vmem:[#allocation2 + $0x78] sm:$0xff]  ;;  %614 = vst [vmem:[%s1080_s29 + $0x18] sm:$0xff] %v598_v55  ;;  %v591_v6 = vadd.f32 %v731_v34, %v568_v59  ;;  %v603_v7 = vmax.f32 %v587_v63, 0.0  ;;  %v604_v8 = vmax.f32 %v588_v0, 0.0  ;;  %v592_v9 = vadd.f32 %v731_v34, %v569_v60 }
 0x133   : > { %v585_v50 = vadd.f32 %v731_v34, %v562_v45  ;;  %615 = vst [vmem:[%s1080_s29 + $0x20] sm:$0xff] %v599_v56  ;;  %v602_v3 = vmax.f32 %v586_v57, 0.0  ;;  %616 = vst [vmem:[%s1080_s29 + $0x28] sm:$0xff] %v600_v61  ;;  %v593_v10 = vadd.f32 %v731_v34, %v570_v1  ;;  %v605_v11 = vmax.f32 %v589_v4, 0.0 }
 0x134   : > { %v606_v12 = vmax.f32 %v590_v5, 0.0  ;;  %v607_v13 = vmax.f32 %v591_v6, 0.0  ;;  %v594_v14 = vadd.f32 %v731_v34, %v571_v2  ;;  %619 = vst [vmem:[%s1080_s29 + $0x40] sm:$0xff] %v603_v7  ;;  %620 = vst [vmem:[%s1080_s29 + $0x48] sm:$0xff] %v604_v8  ;;  %v608_v15 = vmax.f32 %v592_v9, 0.0 }
 0x135   : > { %v601_v62 = vmax.f32 %v585_v50, 0.0  ;;  %618 = vst [vmem:[%s1080_s29 + $0x38] sm:$0xff] %v602_v3  ;;  %v609_v16 = vmax.f32 %v593_v10, 0.0  ;;  %621 = vst [vmem:[%s1080_s29 + $0x50] sm:$0xff] %v605_v11 }
 0x136   : > { %622 = vst [vmem:[%s1080_s29 + $0x58] sm:$0xff] %v606_v12  ;;  %623 = vst [vmem:[%s1080_s29 + $0x60] sm:$0xff] %v607_v13  ;;  %v610_v17 = vmax.f32 %v594_v14, 0.0 }
 0x137   : > { %617 = vst [vmem:[%s1080_s29 + $0x30] sm:$0xff] %v601_v62  ;;  %624 = vst [vmem:[%s1080_s29 + $0x68] sm:$0xff] %v608_v15 }
 0x138   : > { %625 = vst [vmem:[%s1080_s29 + $0x70] sm:$0xff] %v609_v16  ;;  %626 = vst [vmem:[%s1080_s29 + $0x78] sm:$0xff] %v610_v17 }
 0x139 PF: > { %s13_s18 = sadd.s32 1, %s966_s18   ;;  %s1162_s12 = smov %s946_s13 }
 0x13a   : > { %p10_p0 = scmp.ge.s32.totalorder %s13_s18, 6   ;;  %s1163_s13 = smov %s1040_s25 }
 0x13b   : > { %s1164_s14 = smov %s958_s16  ;;  %s1165_s15 = smov %s962_s17 }
 0x13c   : > { %s1166_s16 = smov %s1169_s19  ;;  %s1167_s17 = smov %s1173_s20 }
 0x13d   :  { %12 = sbr.rel (!%p10_p0) target bundleno = 4 (0x4), region = 116 }

// kernel: cc_forward.3
= control target key start
LH: loop header
LB: loop body
LE: loop exit
PB: predicated region body
PF: predicated region fallthrough
CT: control target
= control target key end

     0   :  { %s2694_s0 = inlined_call_operand.vmem [shape: f32[256,256], index: 0, kind: input, shape index: {}]   ;;  %s2695_s1 = inlined_call_operand.vmem [shape: f32[256,128], index: 1, kind: input, shape index: {}]   ;;  %s2696_s2 = inlined_call_operand.vmem [shape: f32[1,128], index: 2, kind: input, shape index: {}]   ;;  %s2697_s3 = inlined_call_operand.vmem [shape: f32[128,64], index: 3, kind: input, shape index: {}]   ;;  %s2698_s4 = inlined_call_operand.vmem [shape: f32[1,64], index: 4, kind: input, shape index: {}]   ;;  %s2699_s5 = inlined_call_operand.vmem [shape: f32[64,256], index: 5, kind: input, shape index: {}]   ;;  %s2700_s6 = inlined_call_operand.vmem [shape: f32[1,256], index: 6, kind: input, shape index: {}]   ;;  %s2701_s7 = inlined_call_operand.vmem [shape: f32[256,128], index: 7, kind: output, shape index: {0}]   ;;  %s2702_s8 = inlined_call_operand.vmem [shape: f32[256,128], index: 8, kind: output, shape index: {1}]  }
   0x1   :  { %2703 = sst [smem:[#allocation4_spill]] %s2694_s0 }
   0x2   :  { %s2096_s27 = smov 0   ;;  %s2098_s28 = smov 0  }
   0x3   :  { %s2100_s29 = smov 0   ;;  %s2102_s30 = smov 0  }
   0x4   :  { %s2104_s9 = smov 0   ;;  %s2106_s10 = smov 0  }
   0x5   :  { %s2108_s11 = smov 0  }
   0x6 LB: > { %s28_s12 = sadd.s32 1, %s2039_s9  ;;  %s31_s13 = sadd.s32 1, %s2043_s10  ;;  %s2047_s11 = sphi %s2108_s11, %s19_s11   ;;  %s2043_s10 = sphi %s2106_s10, %s2710_s10   ;;  %s2039_s9 = sphi %s2104_s9, %s2709_s9   ;;  %s2035_s30 = sphi %s2102_s30, %s2708_s30   ;;  %s2031_s29 = sphi %s2100_s29, %s2707_s29   ;;  %s2027_s28 = sphi %s2098_s28, %s2706_s28   ;;  %s2023_s27 = sphi %s2096_s27, %s2705_s27  }
   0x7   : > { %p29_p0 = scmp.ge.s32.totalorder %s28_s12, 2  ;;  %p47_p1 = scmp.ne.s32.totalorder %s2027_s28, %s2023_s27 }
   0x8   : > { %p48_p2 = scmp.eq.s32.totalorder %s2047_s11, 0  ;;  %s40_s17 = sadd.s32 1, %s2027_s28 }
   0x9   : > { %s2712_s12 = smov (%p29_p0, %s28_s12), 0  ;;  %s2714_s13 = smov (!%p29_p0, %s31_s13), %s2043_s10 }
   0xa   : > { %p49_p3 = por %p48_p2, %p47_p1  ;;  %p33_p4 = scmp.ge.s32.totalorder %s2714_s13, 2 }
   0xb   : > { %s36_s14 = ssub.s32 %s2039_s9, %s2712_s12  ;;  %p1579_p6 = scmp.ge.s32.totalorder %s2047_s11, 4 }
   0xc   : > { %s2716_s13 = smov (%p33_p4, %s2714_s13), 0 }
   0xd   : > { %s35_s15 = ssub.s32 %s2043_s10, %s2716_s13  ;;  %271 = sbr.rel (%p1579_p6) target bundleno = 36 (0x24), region = 36 }
   0xe   : > { %s37_s16 = sor.u32 %s36_s14, %s35_s15 }
   0xf   : > { %p38_p5 = scmp.eq.s32.totalorder %s37_s16, 0 }
  0x11   : > { %s2147_s18 = scalar_select %p38_p5, %s2027_s28, %s40_s17  }
  0x12   : > { %274 = sbr.rel (!%p49_p3) target bundleno = 36 (0x24), region = 40  ;;  %s276_s19 = sand.u32 (%p49_p3), 1, %s2027_s28  }
  0x13   : > { %s1614_s20 = sshll.u32 (%p49_p3), %s2043_s10, 5  ;;  %s1580_s21 = sshll.u32 (%p49_p3), %s276_s19, 7 }
  0x14   : > { %s281_s22 = sadd.s32 (%p49_p3), %s2039_s9, %s1614_s20  ;;  %s2704_s0 = sld [smem:[#allocation4_spill]] (%p49_p3) }
  0x15   : > { %s1583_s23 = sshll.u32 (%p49_p3), %s281_s22, 3  ;;  %s278_s14 = scalar_lea.vmem (%p49_p3), [#allocation3], %s1580_s21 }
  0x1a   : > { %s2156_s26 = scalar_lea.vmem %s2704_s0, %s1583_s23 }
  0x1b   : > { %v342_v0 = vld [vmem:[%s2156_s26] sm:$0xff]  ;;  %v344_v1 = vld [vmem:[%s2156_s26 + $0x10] sm:$0xff] }
  0x1c   : > { %v346_v2 = vld [vmem:[%s2156_s26 + $0x20] sm:$0xff]  ;;  %343 = vst [vmem:[%s278_s14] sm:$0xff] %v342_v0  ;;  %345 = vst [vmem:[%s278_s14 + $0x8] sm:$0xff] %v344_v1  ;;  %v348_v3 = vld [vmem:[%s2156_s26 + $0x30] sm:$0xff] }
  0x1d   : > { %347 = vst [vmem:[%s278_s14 + $0x10] sm:$0xff] %v346_v2  ;;  %v350_v4 = vld [vmem:[%s2156_s26 + $0x40] sm:$0xff]  ;;  %v352_v5 = vld [vmem:[%s2156_s26 + $0x50] sm:$0xff]  ;;  %349 = vst [vmem:[%s278_s14 + $0x18] sm:$0xff] %v348_v3 }
  0x1e   : > { %351 = vst [vmem:[%s278_s14 + $0x20] sm:$0xff] %v350_v4  ;;  %353 = vst [vmem:[%s278_s14 + $0x28] sm:$0xff] %v352_v5  ;;  %v354_v6 = vld [vmem:[%s2156_s26 + $0x60] sm:$0xff]  ;;  %v356_v7 = vld [vmem:[%s2156_s26 + $0x70] sm:$0xff] }
  0x1f   : > { %v358_v8 = vld [vmem:[%s2156_s26 + $0x80] sm:$0xff]  ;;  %355 = vst [vmem:[%s278_s14 + $0x30] sm:$0xff] %v354_v6  ;;  %357 = vst [vmem:[%s278_s14 + $0x38] sm:$0xff] %v356_v7  ;;  %v360_v9 = vld [vmem:[%s2156_s26 + $0x90] sm:$0xff] }
  0x20   : > { %359 = vst [vmem:[%s278_s14 + $0x40] sm:$0xff] %v358_v8  ;;  %v362_v10 = vld [vmem:[%s2156_s26 + $0xa0] sm:$0xff]  ;;  %v364_v11 = vld [vmem:[%s2156_s26 + $0xb0] sm:$0xff]  ;;  %361 = vst [vmem:[%s278_s14 + $0x48] sm:$0xff] %v360_v9 }
  0x21   : > { %363 = vst [vmem:[%s278_s14 + $0x50] sm:$0xff] %v362_v10  ;;  %365 = vst [vmem:[%s278_s14 + $0x58] sm:$0xff] %v364_v11  ;;  %v366_v12 = vld [vmem:[%s2156_s26 + $0xc0] sm:$0xff]  ;;  %v368_v13 = vld [vmem:[%s2156_s26 + $0xd0] sm:$0xff] }
  0x22   : > { %v370_v14 = vld [vmem:[%s2156_s26 + $0xe0] sm:$0xff]  ;;  %367 = vst [vmem:[%s278_s14 + $0x60] sm:$0xff] %v366_v12  ;;  %369 = vst [vmem:[%s278_s14 + $0x68] sm:$0xff] %v368_v13  ;;  %v372_v15 = vld [vmem:[%s2156_s26 + $0xf0] sm:$0xff] }
  0x23   : > { %371 = vst [vmem:[%s278_s14 + $0x70] sm:$0xff] %v370_v14  ;;  %373 = vst [vmem:[%s278_s14 + $0x78] sm:$0xff] %v372_v15 }
  0x24 PF: > { %p1584_p7 = scmp.ge.s32.totalorder %s2047_s11, 1  ;;  %p387_p8 = scmp.lt.s32.totalorder %s2047_s11, 5 }
  0x26   : > { %p388_p9 = pnand %p1584_p7, %p387_p8 }
  0x27   : > { %s394_s15 = sand.u32 (!%p388_p9), 1, %s2023_s27   ;;  %s1586_s16 = sshll.u32 (!%p388_p9), %s2031_s29, 4 }
  0x28   : > { %391 = sbr.rel (%p388_p9) target bundleno = 1102 (0x44e), region = 82  ;;  %s1585_s17 = sshll.u32 (!%p388_p9), %s394_s15, 7 }
  0x29   : > { %p439_p10 = scmp.lt.s32.totalorder (!%p388_p9), %s1586_s16, 31  ;;  %s1588_s19 = sshll.u32 (!%p388_p9), %s2035_s30, 4 }
  0x2a   : > { %p445_p11 = scmp.lt.s32.totalorder (!%p388_p9), %s1588_s19, 31  ;;  %s2194_s30 = scalar_lea.vmem (!%p388_p9), [#allocation3], %s1585_s17 }
  0x2b   : > { %p1592_p12 = scmp.ne.s32.totalorder (!%p388_p9), %s2031_s29, 0 }
  0x2d   : > { %s2718_s16 = smov (!%p439_p10, %s1586_s16), 31  ;;  %s2720_s19 = smov (!%p445_p11, %s1588_s19), 31 }
  0x2e   : > { %s1587_s20 = sshll.u32 %s2718_s16, 3  ;;  %s1589_s24 = sshll.u32 %s2720_s19, 3 }
  0x2f   : > { %s2182_s23 = scalar_lea.vmem %s2695_s1, %s1587_s20  ;;  %s2187_s14 = scalar_lea.vmem %s2701_s7, %s1589_s24 }
  0x30   : > { %s2192_s15 = scalar_lea.vmem %s2702_s8, %s1589_s24  ;;  %459 = sbr.rel (%p1592_p12) target bundleno = 62 (0x3e), region = 90 }
  0x35   : > { %v2049_v16 = vmov 0.0  }
  0x36   : > { %460 = vst [vmem:[#allocation2 + $0x30] sm:$0xff] %v2049_v16  ;;  %461 = vst [vmem:[#allocation2] sm:$0xff] %v2049_v16 }
  0x37   : > { %462 = vst [vmem:[#allocation2 + $0x58] sm:$0xff] %v2049_v16  ;;  %463 = vst [vmem:[#allocation2 + $0x18] sm:$0xff] %v2049_v16 }
  0x38   : > { %464 = vst [vmem:[#allocation2 + $0x50] sm:$0xff] %v2049_v16  ;;  %465 = vst [vmem:[#allocation2 + $0x68] sm:$0xff] %v2049_v16 }
  0x39   : > { %466 = vst [vmem:[#allocation2 + $0x8] sm:$0xff] %v2049_v16  ;;  %467 = vst [vmem:[#allocation2 + $0x48] sm:$0xff] %v2049_v16 }
  0x3a   : > { %468 = vst [vmem:[#allocation2 + $0x40] sm:$0xff] %v2049_v16  ;;  %469 = vst [vmem:[#allocation2 + $0x20] sm:$0xff] %v2049_v16 }
  0x3b   : > { %470 = vst [vmem:[#allocation2 + $0x10] sm:$0xff] %v2049_v16  ;;  %471 = vst [vmem:[#allocation2 + $0x38] sm:$0xff] %v2049_v16 }
  0x3c   : > { %472 = vst [vmem:[#allocation2 + $0x60] sm:$0xff] %v2049_v16  ;;  %473 = vst [vmem:[#allocation2 + $0x70] sm:$0xff] %v2049_v16 }
  0x3d   : > { %474 = vst [vmem:[#allocation2 + $0x78] sm:$0xff] %v2049_v16  ;;  %475 = vst [vmem:[#allocation2 + $0x28] sm:$0xff] %v2049_v16 }
  0x3e PF: > { %v523_v17 = vld [vmem:[%s2182_s23 + $0x78] sm:$0xff]  ;;  %v522_v18 = vld [vmem:[%s2182_s23 + $0x70] sm:$0xff]  ;;  %v521_v19 = vld [vmem:[%s2182_s23 + $0x68] sm:$0xff]  ;;  %p1593_p13 = scmp.ne.s32.totalorder %s2031_s29, 1 }
  0x3f   : > { %1679 = vmatprep.subr.mxu0 %v523_v17  ;;  %1791 = vmatprep.subr.mxu1 %v523_v17  ;;  %v520_v20 = vld [vmem:[%s2182_s23 + $0x60] sm:$0xff]  ;;  %v519_v21 = vld [vmem:[%s2182_s23 + $0x58] sm:$0xff]  ;;  %v518_v22 = vld [vmem:[%s2182_s23 + $0x50] sm:$0xff] }
  0x40   : > { %1680 = vmatpush3.msra.mxu0 %v523_v17  ;;  %1807 = vmatpush3.msra.mxu1 %v523_v17  ;;  %v517_v23 = vld [vmem:[%s2182_s23 + $0x48] sm:$0xff]  ;;  %v516_v24 = vld [vmem:[%s2182_s23 + $0x40] sm:$0xff]  ;;  %v515_v25 = vld [vmem:[%s2182_s23 + $0x38] sm:$0xff] }
  0x41   : > { %1681 = vmatprep.subr.mxu0 %v522_v18  ;;  %1792 = vmatprep.subr.mxu1 %v522_v18  ;;  %v514_v26 = vld [vmem:[%s2182_s23 + $0x30] sm:$0xff]  ;;  %v513_v27 = vld [vmem:[%s2182_s23 + $0x28] sm:$0xff]  ;;  %v512_v28 = vld [vmem:[%s2182_s23 + $0x20] sm:$0xff] }
  0x42   : > { %1682 = vmatpush3.msra.mxu0 %v522_v18  ;;  %1808 = vmatpush3.msra.mxu1 %v522_v18  ;;  %v511_v29 = vld [vmem:[%s2182_s23 + $0x18] sm:$0xff]  ;;  %v510_v30 = vld [vmem:[%s2182_s23 + $0x10] sm:$0xff]  ;;  %v509_v31 = vld [vmem:[%s2182_s23 + $0x8] sm:$0xff] }
  0x43   : > { %1683 = vmatprep.subr.mxu0 %v521_v19  ;;  %1793 = vmatprep.subr.mxu1 %v521_v19  ;;  %v508_v32 = vld [vmem:[%s2182_s23] sm:$0xff]  ;;  %v493_v35 = vld [vmem:[%s2194_s30 + $0x8] sm:$0xff]  ;;  %v494_v37 = vld [vmem:[%s2194_s30 + $0x10] sm:$0xff] }
  0x44   : > { %1684 = vmatpush3.msra.mxu0 %v521_v19  ;;  %1809 = vmatpush3.msra.mxu1 %v521_v19  ;;  %v492_v33 = vld [vmem:[%s2194_s30] sm:$0xff]  ;;  %v501_v36 = vld [vmem:[%s2194_s30 + $0x48] sm:$0xff]  ;;  %v502_v38 = vld [vmem:[%s2194_s30 + $0x50] sm:$0xff] }
  0x45   : > { %1685 = vmatprep.subr.mxu0 %v520_v20  ;;  %1794 = vmatprep.subr.mxu1 %v520_v20  ;;  %v500_v34 = vld [vmem:[%s2194_s30 + $0x40] sm:$0xff]  ;;  %v495_v39 = vld [vmem:[%s2194_s30 + $0x18] sm:$0xff]  ;;  %v497_v43 = vld [vmem:[%s2194_s30 + $0x28] sm:$0xff] }
  0x46   : > { %1686 = vmatpush3.msra.mxu0 %v520_v20  ;;  %1810 = vmatpush3.msra.mxu1 %v520_v20  ;;  %v503_v40 = vld [vmem:[%s2194_s30 + $0x58] sm:$0xff]  ;;  %v496_v41 = vld [vmem:[%s2194_s30 + $0x20] sm:$0xff]  ;;  %v505_v44 = vld [vmem:[%s2194_s30 + $0x68] sm:$0xff] }
  0x47   : > { %1687 = vmatprep.subr.mxu0 %v519_v21  ;;  %1795 = vmatprep.subr.mxu1 %v519_v21  ;;  %v504_v42 = vld [vmem:[%s2194_s30 + $0x60] sm:$0xff]  ;;  %v498_v45 = vld [vmem:[%s2194_s30 + $0x30] sm:$0xff]  ;;  %v499_v47 = vld [vmem:[%s2194_s30 + $0x38] sm:$0xff] }
  0x48   : > { %1688 = vmatpush3.msra.mxu0 %v519_v21  ;;  %1811 = vmatpush3.msra.mxu1 %v519_v21  ;;  %v506_v46 = vld [vmem:[%s2194_s30 + $0x70] sm:$0xff]  ;;  %v507_v48 = vld [vmem:[%s2194_s30 + $0x78] sm:$0xff]  ;;  %v477_v49 = vld [vmem:[#allocation2] sm:$0xff] }
  0x49   : > { %1689 = vmatprep.subr.mxu0 %v518_v22  ;;  %1796 = vmatprep.subr.mxu1 %v518_v22  ;;  %v485_v50 = vld [vmem:[#allocation2 + $0x20] sm:$0xff]  ;;  %v476_v53 = vld [vmem:[#allocation2 + $0x30] sm:$0xff]  ;;  %v479_v59 = vld [vmem:[#allocation2 + $0x18] sm:$0xff] }
  0x4a   : > { %1690 = vmatpush3.msra.mxu0 %v518_v22  ;;  %1812 = vmatpush3.msra.mxu1 %v518_v22  ;;  %v484_v54 = vld [vmem:[#allocation2 + $0x40] sm:$0xff]  ;;  %v487_v60 = vld [vmem:[#allocation2 + $0x38] sm:$0xff]  ;;  %v486_v2 = vld [vmem:[#allocation2 + $0x10] sm:$0xff] }
  0x4b   : > { %1691 = vmatprep.subr.mxu0 %v517_v23  ;;  %1797 = vmatprep.subr.mxu1 %v517_v23  ;;  %v478_v1 = vld [vmem:[#allocation2 + $0x58] sm:$0xff]  ;;  %v481_v7 = vld [vmem:[#allocation2 + $0x68] sm:$0xff]  ;;  %v489_v8 = vld [vmem:[#allocation2 + $0x70] sm:$0xff] }
  0x4c   : > { %1692 = vmatpush3.msra.mxu0 %v517_v23  ;;  %1813 = vmatpush3.msra.mxu1 %v517_v23  ;;  %v480_v13 = vld [vmem:[#allocation2 + $0x50] sm:$0xff]  ;;  %v488_v14 = vld [vmem:[#allocation2 + $0x60] sm:$0xff]  ;;  %v483_v19 = vld [vmem:[#allocation2 + $0x48] sm:$0xff] }
  0x4d   : > { %1693 = vmatprep.subr.mxu0 %v516_v24  ;;  %1798 = vmatprep.subr.mxu1 %v516_v24  ;;  %v491_v20 = vld [vmem:[#allocation2 + $0x28] sm:$0xff] }
  0x4e   : > { %1694 = vmatpush3.msra.mxu0 %v516_v24  ;;  %1814 = vmatpush3.msra.mxu1 %v516_v24 }
  0x4f   : > { %1695 = vmatprep.subr.mxu0 %v515_v25  ;;  %1799 = vmatprep.subr.mxu1 %v515_v25 }
  0x50   : > { %1696 = vmatpush3.msra.mxu0 %v515_v25  ;;  %1815 = vmatpush3.msra.mxu1 %v515_v25  ;;  %v482_v25 = vld [vmem:[#allocation2 + $0x8] sm:$0xff] }
  0x51   : > { %1697 = vmatprep.subr.mxu0 %v514_v26  ;;  %1800 = vmatprep.subr.mxu1 %v514_v26 }
  0x52   : > { %1698 = vmatpush3.msra.mxu0 %v514_v26  ;;  %1816 = vmatpush3.msra.mxu1 %v514_v26  ;;  %v490_v26 = vld [vmem:[#allocation2 + $0x78] sm:$0xff] }
  0x53   : > { %1699 = vmatprep.subr.mxu0 %v513_v27  ;;  %1801 = vmatprep.subr.mxu1 %v513_v27 }
  0x54   : > { %1700 = vmatpush3.msra.mxu0 %v513_v27  ;;  %1817 = vmatpush3.msra.mxu1 %v513_v27 }
  0x55   : > { %1701 = vmatprep.subr.mxu0 %v512_v28  ;;  %1802 = vmatprep.subr.mxu1 %v512_v28 }
  0x56   : > { %1702 = vmatpush3.msra.mxu0 %v512_v28  ;;  %1818 = vmatpush3.msra.mxu1 %v512_v28 }
  0x57   : > { %1703 = vmatprep.subr.mxu0 %v511_v29  ;;  %1803 = vmatprep.subr.mxu1 %v511_v29 }
  0x58   : > { %1704 = vmatpush3.msra.mxu0 %v511_v29  ;;  %1819 = vmatpush3.msra.mxu1 %v511_v29 }
  0x59   : > { %1705 = vmatprep.subr.mxu0 %v510_v30  ;;  %1804 = vmatprep.subr.mxu1 %v510_v30 }
  0x5a   : > { %1706 = vmatpush3.msra.mxu0 %v510_v30  ;;  %1820 = vmatpush3.msra.mxu1 %v510_v30 }
  0x5b   : > { %1707 = vmatprep.subr.mxu0 %v509_v31  ;;  %1805 = vmatprep.subr.mxu1 %v509_v31 }
  0x5c   : > { %1708 = vmatpush3.msra.mxu0 %v509_v31  ;;  %1821 = vmatpush3.msra.mxu1 %v509_v31 }
  0x5d   : > { %1709 = vmatprep.subr.mxu0 %v508_v32  ;;  %1806 = vmatprep.subr.mxu1 %v508_v32 }
  0x5e   : > { %1710 = vmatpush3.msra.mxu0 %v508_v32  ;;  %1822 = vmatpush3.msra.mxu1 %v508_v32 }
  0x5f   : > { %1711 = vmatprep.mubr.f32.mxu0 %v492_v33  ;;  %1723 = vmatprep.mubr.f32.mxu1 %v500_v34 }
  0x60   : > { %1712 = vmatmul.mubr.f32.vlgmr.msra.gmra.mxu0 %v493_v35  ;;  %1724 = vmatmul.mubr.f32.vlgmr.msra.gmra.mxu1 %v501_v36 }
  0x61   : > { %1714 = vmatprep.mubr.f32.mxu0 %v494_v37  ;;  %1726 = vmatprep.mubr.f32.mxu1 %v502_v38 }
  0x64   : > { %1715 = vmatmul.mubr.f32.gmra.mxu0 %v495_v39  ;;  %1727 = vmatmul.mubr.f32.gmra.mxu1 %v503_v40 }
  0x65   : > { %1717 = vmatprep.mubr.f32.mxu0 %v496_v41  ;;  %1729 = vmatprep.mubr.f32.mxu1 %v504_v42 }
  0x68   : > { %1718 = vmatmul.mubr.f32.gmra.mxu0 %v497_v43  ;;  %1730 = vmatmul.mubr.f32.gmra.mxu1 %v505_v44 }
  0x69   : > { %1720 = vmatprep.mubr.f32.mxu0 %v498_v45  ;;  %1732 = vmatprep.mubr.f32.mxu1 %v506_v46 }
  0x6c   : > { %1721 = vmatmul.mubr.f32.gmra.mxu0 %v499_v47  ;;  %1733 = vmatmul.mubr.f32.gmra.mxu1 %v507_v48 }
 0x120   : > { %v1713_v51 = vpop.f32.mrf.mxu0  ;;  %v1725_v52 = vpop.f32.mrf.mxu1 }
 0x121   : > { %v670_v55 = vadd.f32 %v1713_v51, %v477_v49  ;;  %v678_v56 = vadd.f32 %v1725_v52, %v485_v50 }
 0x122   : > { %v590_v57 = vpop.f32.mrf.mxu0  ;;  %v630_v58 = vpop.f32.mrf.mxu1 }
 0x123   : > { %686 = vst [vmem:[#allocation2] sm:$0xff] %v670_v55  ;;  %694 = vst [vmem:[#allocation2 + $0x20] sm:$0xff] %v678_v56  ;;  %v669_v61 = vadd.f32 %v590_v57, %v476_v53  ;;  %v677_v62 = vadd.f32 %v630_v58, %v484_v54 }
 0x124   : > { %v1716_v63 = vpop.f32.mrf.mxu0  ;;  %v1728_v0 = vpop.f32.mrf.mxu1 }
 0x125   : > { %685 = vst [vmem:[#allocation2 + $0x30] sm:$0xff] %v669_v61  ;;  %693 = vst [vmem:[#allocation2 + $0x40] sm:$0xff] %v677_v62  ;;  %v672_v3 = vadd.f32 %v1716_v63, %v479_v59  ;;  %v680_v4 = vadd.f32 %v1728_v0, %v487_v60 }
 0x126   : > { %v600_v5 = vpop.f32.mrf.mxu0  ;;  %v640_v6 = vpop.f32.mrf.mxu1 }
 0x127   : > { %688 = vst [vmem:[#allocation2 + $0x18] sm:$0xff] %v672_v3  ;;  %696 = vst [vmem:[#allocation2 + $0x38] sm:$0xff] %v680_v4  ;;  %v671_v9 = vadd.f32 %v600_v5, %v478_v1  ;;  %v679_v10 = vadd.f32 %v640_v6, %v486_v2 }
 0x128   : > { %v1719_v11 = vpop.f32.mrf.mxu0  ;;  %v1731_v12 = vpop.f32.mrf.mxu1 }
 0x129   : > { %687 = vst [vmem:[#allocation2 + $0x58] sm:$0xff] %v671_v9  ;;  %695 = vst [vmem:[#allocation2 + $0x10] sm:$0xff] %v679_v10  ;;  %v674_v15 = vadd.f32 %v1719_v11, %v481_v7  ;;  %v682_v16 = vadd.f32 %v1731_v12, %v489_v8 }
 0x12a   : > { %v610_v17 = vpop.f32.mrf.mxu0  ;;  %v650_v18 = vpop.f32.mrf.mxu1 }
 0x12b   : > { %690 = vst [vmem:[#allocation2 + $0x68] sm:$0xff] %v674_v15  ;;  %698 = vst [vmem:[#allocation2 + $0x70] sm:$0xff] %v682_v16  ;;  %v673_v21 = vadd.f32 %v610_v17, %v480_v13  ;;  %v681_v22 = vadd.f32 %v650_v18, %v488_v14 }
 0x12c   : > { %v1722_v23 = vpop.f32.mrf.mxu0  ;;  %v1734_v24 = vpop.f32.mrf.mxu1 }
 0x12d   : > { %689 = vst [vmem:[#allocation2 + $0x50] sm:$0xff] %v673_v21  ;;  %697 = vst [vmem:[#allocation2 + $0x60] sm:$0xff] %v681_v22  ;;  %v676_v27 = vadd.f32 %v1722_v23, %v483_v19  ;;  %v684_v28 = vadd.f32 %v1734_v24, %v491_v20  ;;  %704 = sbr.rel (%p1593_p13) target bundleno = 1102 (0x44e), region = 94 }
 0x12e   : > { %v620_v29 = vpop.f32.mrf.mxu0  ;;  %v660_v30 = vpop.f32.mrf.mxu1 }
 0x12f   : > { %692 = vst [vmem:[#allocation2 + $0x48] sm:$0xff] %v676_v27  ;;  %700 = vst [vmem:[#allocation2 + $0x28] sm:$0xff] %v684_v28  ;;  %v675_v31 = vadd.f32 %v620_v29, %v482_v25  ;;  %v683_v32 = vadd.f32 %v660_v30, %v490_v26 }
 0x131   : > { %691 = vst [vmem:[#allocation2 + $0x8] sm:$0xff] %v675_v31  ;;  %699 = vst [vmem:[#allocation2 + $0x78] sm:$0xff] %v683_v32 }
 0x132   : > { %v775_v33 = vld [vmem:[%s2697_s3 + $0x78] sm:$0xff]  ;;  %v774_v34 = vld [vmem:[%s2697_s3 + $0x70] sm:$0xff]  ;;  %v773_v35 = vld [vmem:[%s2697_s3 + $0x68] sm:$0xff]  ;;  %vm972_vm0 = vcmask 523264  }
 0x133   : > { %1735 = vmatprep.subr.mxu0 %v775_v33  ;;  %v772_v36 = vld [vmem:[%s2697_s3 + $0x60] sm:$0xff]  ;;  %v705_v37 = vld [vmem:[#allocation2 + $0x30] sm:$0xff]  ;;  %v771_v39 = vld [vmem:[%s2697_s3 + $0x58] sm:$0xff] }
 0x134   : > { %1736 = vmatpush3.msra.mxu0 %v775_v33  ;;  %v2245_v38 = vld [vmem:[%s2696_s2] ss:$0 sm:$0xff]  ;;  %v770_v41 = vld [vmem:[%s2697_s3 + $0x50] sm:$0xff]  ;;  %v769_v43 = vld [vmem:[%s2697_s3 + $0x48] sm:$0xff] }
 0x135   : > { %1737 = vmatprep.subr.mxu0 %v774_v34  ;;  %v728_v40 = vadd.f32 %v2245_v38, %v705_v37  ;;  %v2260_v44 = vld [vmem:[%s2699_s5 + $0x78] sm:$0xff]  ;;  %v768_v45 = vld [vmem:[%s2697_s3 + $0x40] sm:$0xff]  ;;  %v2268_v46 = vld [vmem:[%s2699_s5 + $0x70] sm:$0xff] }
 0x136   : > { %1738 = vmatpush3.msra.mxu0 %v774_v34  ;;  %1823 = vmatprep.subr.mxu1 %v2260_v44  ;;  %v2274_v47 = vld [vmem:[%s2699_s5 + $0x68] sm:$0xff]  ;;  %v767_v48 = vld [vmem:[%s2697_s3 + $0x38] sm:$0xff]  ;;  %v956_v49 = vld [vmem:[%s2699_s5 + $0x60] sm:$0xff] }
 0x137   : > { %1739 = vmatprep.subr.mxu0 %v773_v35  ;;  %v744_v42 = vmax.f32 %v728_v40, 0.0  ;;  %1831 = vmatpush1.msra.mxu1 %v2268_v46  ;;  %v955_v50 = vld [vmem:[%s2699_s5 + $0x58] sm:$0xff]  ;;  %v766_v51 = vld [vmem:[%s2697_s3 + $0x30] sm:$0xff]  ;;  %v953_v53 = vld [vmem:[%s2699_s5 + $0x48] sm:$0xff] }
 0x138   : > { %1740 = vmatpush3.msra.mxu0 %v773_v35  ;;  %1824 = vmatprep.subr.mxu1 %v2274_v47  ;;  %v954_v52 = vld [vmem:[%s2699_s5 + $0x50] sm:$0xff]  ;;  %v765_v54 = vld [vmem:[%s2697_s3 + $0x28] sm:$0xff]  ;;  %v952_v55 = vld [vmem:[%s2699_s5 + $0x40] sm:$0xff] }
 0x139   : > { %1741 = vmatprep.subr.mxu0 %v772_v36  ;;  %1767 = vmatprep.mubr.f32.mxu0 %v744_v42  ;;  %v951_v56 = vld [vmem:[%s2699_s5 + $0x38] sm:$0xff]  ;;  %v764_v57 = vld [vmem:[%s2697_s3 + $0x20] sm:$0xff]  ;;  %v762_v61 = vld [vmem:[%s2697_s3 + $0x10] sm:$0xff] }
 0x13a   : > { %1742 = vmatpush3.msra.mxu0 %v772_v36  ;;  %1832 = vmatpush1.msra.mxu1 %v956_v49  ;;  %v763_v58 = vld [vmem:[%s2697_s3 + $0x18] sm:$0xff]  ;;  %v706_v59 = vld [vmem:[#allocation2] sm:$0xff]  ;;  %v761_v63 = vld [vmem:[%s2697_s3 + $0x8] sm:$0xff] }
 0x13b   : > { %1743 = vmatprep.subr.mxu0 %v771_v39  ;;  %1825 = vmatprep.subr.mxu1 %v955_v50  ;;  %v707_v60 = vld [vmem:[#allocation2 + $0x58] sm:$0xff]  ;;  %v729_v62 = vadd.f32 %v2245_v38, %v706_v59  ;;  %v709_v2 = vld [vmem:[#allocation2 + $0x50] sm:$0xff]  ;;  %v760_v3 = vld [vmem:[%s2697_s3] sm:$0xff] }
 0x13c   : > { %1744 = vmatpush3.msra.mxu0 %v771_v39  ;;  %1833 = vmatpush1.msra.mxu1 %v954_v52  ;;  %v730_v0 = vadd.f32 %v2245_v38, %v707_v60  ;;  %v708_v1 = vld [vmem:[#allocation2 + $0x18] sm:$0xff]  ;;  %v732_v7 = vadd.f32 %v2245_v38, %v709_v2  ;;  %v710_v8 = vld [vmem:[#allocation2 + $0x68] sm:$0xff]  ;;  %v713_v15 = vld [vmem:[#allocation2 + $0x40] sm:$0xff] }
 0x13d   : > { %1745 = vmatprep.subr.mxu0 %v770_v41  ;;  %1826 = vmatprep.subr.mxu1 %v953_v53  ;;  %v745_v4 = vmax.f32 %v729_v62, 0.0  ;;  %v731_v5 = vadd.f32 %v2245_v38, %v708_v1  ;;  %v711_v9 = vld [vmem:[#allocation2 + $0x8] sm:$0xff]  ;;  %v733_v11 = vadd.f32 %v2245_v38, %v710_v8  ;;  %v736_v19 = vadd.f32 %v2245_v38, %v713_v15  ;;  %v714_v20 = vld [vmem:[#allocation2 + $0x20] sm:$0xff]  ;;  %v715_v21 = vld [vmem:[#allocation2 + $0x10] sm:$0xff] }
 0x13e   : > { %1746 = vmatpush3.msra.mxu0 %v770_v41  ;;  %1834 = vmatpush1.msra.mxu1 %v952_v55  ;;  %v746_v6 = vmax.f32 %v730_v0, 0.0  ;;  %v748_v12 = vmax.f32 %v732_v7, 0.0  ;;  %v734_v13 = vadd.f32 %v2245_v38, %v711_v9  ;;  %v712_v14 = vld [vmem:[#allocation2 + $0x48] sm:$0xff]  ;;  %v737_v23 = vadd.f32 %v2245_v38, %v714_v20  ;;  %v716_v26 = vld [vmem:[#allocation2 + $0x38] sm:$0xff]  ;;  %v717_v27 = vld [vmem:[#allocation2 + $0x60] sm:$0xff] }
 0x13f   : > { %1747 = vmatprep.subr.mxu0 %v769_v43  ;;  %1827 = vmatprep.subr.mxu1 %v951_v56  ;;  %v747_v10 = vmax.f32 %v731_v5, 0.0  ;;  %v749_v16 = vmax.f32 %v733_v11, 0.0  ;;  %v735_v17 = vadd.f32 %v2245_v38, %v712_v14  ;;  %v752_v24 = vmax.f32 %v736_v19, 0.0  ;;  %v718_v32 = vld [vmem:[#allocation2 + $0x70] sm:$0xff]  ;;  %v719_v33 = vld [vmem:[#allocation2 + $0x78] sm:$0xff]  ;;  %v720_v39 = vld [vmem:[#allocation2 + $0x28] sm:$0xff] }
 0x140   : > { %1748 = vmatpush3.msra.mxu0 %v769_v43  ;;  %v750_v18 = vmax.f32 %v734_v13, 0.0  ;;  %v738_v25 = vadd.f32 %v2245_v38, %v715_v21  ;;  %v753_v28 = vmax.f32 %v737_v23, 0.0  ;;  %v739_v29 = vadd.f32 %v2245_v38, %v716_v26 }
 0x141   : > { %1749 = vmatprep.subr.mxu0 %v768_v45  ;;  %v751_v22 = vmax.f32 %v735_v17, 0.0  ;;  %v740_v31 = vadd.f32 %v2245_v38, %v717_v27  ;;  %v741_v35 = vadd.f32 %v2245_v38, %v718_v32  ;;  %v742_v37 = vadd.f32 %v2245_v38, %v719_v33 }
 0x142   : > { %1750 = vmatpush3.msra.mxu0 %v768_v45  ;;  %v754_v30 = vmax.f32 %v738_v25, 0.0  ;;  %v755_v34 = vmax.f32 %v739_v29, 0.0  ;;  %v743_v41 = vadd.f32 %v2245_v38, %v720_v39  ;;  %v949_v45 = vld [vmem:[%s2699_s5 + $0x28] sm:$0xff]  ;;  %v948_v38 = vld [vmem:[%s2699_s5 + $0x20] sm:$0xff] }
 0x143   : > { %1751 = vmatprep.subr.mxu0 %v767_v48  ;;  %v756_v36 = vmax.f32 %v740_v31, 0.0  ;;  %v757_v40 = vmax.f32 %v741_v35, 0.0  ;;  %v758_v42 = vmax.f32 %v742_v37, 0.0 }
 0x144   : > { %1752 = vmatpush3.msra.mxu0 %v767_v48  ;;  %v759_v43 = vmax.f32 %v743_v41, 0.0  ;;  %v945_v48 = vld [vmem:[%s2699_s5 + $0x8] sm:$0xff] }
 0x145   : > { %1753 = vmatprep.subr.mxu0 %v766_v51 }
 0x146   : > { %1754 = vmatpush3.msra.mxu0 %v766_v51 }
 0x147   : > { %1755 = vmatprep.subr.mxu0 %v765_v54 }
 0x148   : > { %1756 = vmatpush3.msra.mxu0 %v765_v54 }
 0x149   : > { %1757 = vmatprep.subr.mxu0 %v764_v57 }
 0x14a   : > { %1758 = vmatpush3.msra.mxu0 %v764_v57 }
 0x14b   : > { %1759 = vmatprep.subr.mxu0 %v763_v58 }
 0x14c   : > { %1760 = vmatpush3.msra.mxu0 %v763_v58 }
 0x14d   : > { %1761 = vmatprep.subr.mxu0 %v762_v61 }
 0x14e   : > { %1762 = vmatpush3.msra.mxu0 %v762_v61 }
 0x14f   : > { %1763 = vmatprep.subr.mxu0 %v761_v63 }
 0x150   : > { %1764 = vmatpush3.msra.mxu0 %v761_v63 }
 0x151   : > { %1765 = vmatprep.subr.mxu0 %v760_v3 }
 0x152   : > { %1766 = vmatpush3.msra.mxu0 %v760_v3 }
 0x153   : > { %1768 = vmatmul.mubr.f32.vlgmr.msra.gmra.mxu0 %v745_v4  ;;  %1037 = vmatprep.subr.mxu0 %v2260_v44  ;;  %v950_v44 = vld [vmem:[%s2699_s5 + $0x30] sm:$0xff] }
 0x154   : > { %1770 = vmatprep.mubr.f32.mxu0 %v746_v6  ;;  %1038 = vmatpush1.msra.mxu0 %v2268_v46  ;;  %v947_v46 = vld [vmem:[%s2699_s5 + $0x18] sm:$0xff] }
 0x155   : > { %1039 = vmatprep.subr.mxu0 %v2274_v47  ;;  %1835 = vmatpush1.msra.mxu1 %v950_v44  ;;  %v946_v47 = vld [vmem:[%s2699_s5 + $0x10] sm:$0xff] }
 0x156   : > { %1040 = vmatpush1.msra.mxu0 %v956_v49  ;;  %1828 = vmatprep.subr.mxu1 %v949_v45  ;;  %v944_v49 = vld [vmem:[%s2699_s5] sm:$0xff] }
 0x157   : > { %1771 = vmatmul.mubr.f32.gmra.mxu0 %v747_v10  ;;  %1041 = vmatprep.subr.mxu0 %v955_v50  ;;  %v2050_v50 = vmov 0.0  }
 0x158   : > { %1773 = vmatprep.mubr.f32.mxu0 %v748_v12  ;;  %1042 = vmatpush1.msra.mxu0 %v954_v52  ;;  %v2364_v52 = vld [vmem:[%s2698_s4] ss:$0 sm:$0xff] }
 0x159   : > { %1043 = vmatprep.subr.mxu0 %v953_v53  ;;  %1836 = vmatpush1.msra.mxu1 %v948_v38 }
 0x15a   : > { %1044 = vmatpush1.msra.mxu0 %v952_v55  ;;  %1829 = vmatprep.subr.mxu1 %v947_v46 }
 0x15b   : > { %1774 = vmatmul.mubr.f32.gmra.mxu0 %v749_v16  ;;  %1045 = vmatprep.subr.mxu0 %v951_v56 }
 0x15c   : > { %1776 = vmatprep.mubr.f32.mxu0 %v750_v18  ;;  %1046 = vmatpush1.msra.mxu0 %v950_v44 }
 0x15d   : > { %1047 = vmatprep.subr.mxu0 %v949_v45  ;;  %1837 = vmatpush1.msra.mxu1 %v946_v47 }
 0x15e   : > { %1048 = vmatpush1.msra.mxu0 %v948_v38  ;;  %1830 = vmatprep.subr.mxu1 %v945_v48 }
 0x15f   : > { %1777 = vmatmul.mubr.f32.gmra.mxu0 %v751_v22  ;;  %1049 = vmatprep.subr.mxu0 %v947_v46 }
 0x160   : > { %1779 = vmatprep.mubr.f32.mxu0 %v752_v24  ;;  %1050 = vmatpush1.msra.mxu0 %v946_v47 }
 0x161   : > { %1051 = vmatprep.subr.mxu0 %v945_v48  ;;  %1838 = vmatpush1.msra.mxu1 %v944_v49 }
 0x162   : > { %1052 = vmatpush1.msra.mxu0 %v944_v49  ;;  %1097 = vmatprep.mubr.f32.mxu1 %v2050_v50 }
 0x163   : > { %1780 = vmatmul.mubr.f32.gmra.mxu0 %v753_v28 }
 0x164   : > { %1782 = vmatprep.mubr.f32.mxu0 %v754_v30 }
 0x167   : > { %1783 = vmatmul.mubr.f32.gmra.mxu0 %v755_v34 }
 0x168   : > { %1785 = vmatprep.mubr.f32.mxu0 %v756_v36  ;;  %v962_v36 = vlaneseq }
 0x16a   : > { %v963_v37 = vshrl.u32 %v962_v36, 7 }
 0x16b   : > { %1786 = vmatmul.mubr.f32.gmra.mxu0 %v757_v40  ;;  %v960_v40 = vld [vmem:[%s2700_s6] sm:$0x3] }
 0x16c   : > { %1788 = vmatprep.mubr.f32.mxu0 %v758_v42  ;;  %v968_v39 = vsub.s32 1, %v963_v37 }
 0x16e   : > { %v2415_v41 = vrot.slane %v960_v40, %v968_v39 }
 0x16f   : > { %1789 = vmatmul.mubr.f32.gmra.mxu0 %v759_v43 }
 0x170   : > { %1085 = vmatprep.mubr.f32.mxu0 %v2050_v50 }
 0x213   : > { %v1769_v51 = vpop.f32.mrf.mxu0 }
 0x214   : > { %v855_v56 = vadd.f32 %v1769_v51, %v2364_v52 }
 0x215   : > { %v849_v53 = vpop.f32.mrf.mxu0 }
 0x216   : > { %v850_v54 = vadd.f32 %v2364_v52, %v849_v53  ;;  %v929_v61 = vmax.f32 %v855_v56, 0.0 }
 0x217   : > { %v1772_v55 = vpop.f32.mrf.mxu0 }
 0x218   : > { %v928_v57 = vmax.f32 %v850_v54, 0.0  ;;  %v865_v62 = vadd.f32 %v1772_v55, %v2364_v52 }
 0x219   : > { %v859_v58 = vpop.f32.mrf.mxu0 }
 0x21a   : > { %v860_v59 = vadd.f32 %v2364_v52, %v859_v58  ;;  %1596 = vmatmul.mubr.msk.f32.vlgmr.msra.gmra.mxu0 %vm972_vm0, %v928_v57  ;;  %v931_v1 = vmax.f32 %v865_v62, 0.0 }
 0x21b   : > { %v1775_v60 = vpop.f32.mrf.mxu0  ;;  %1091 = vmatprep.mubr.f32.mxu0 %v2050_v50 }
 0x21c   : > { %v930_v63 = vmax.f32 %v860_v59, 0.0  ;;  %v875_v4 = vadd.f32 %v1775_v60, %v2364_v52 }
 0x21d   : > { %v869_v0 = vpop.f32.mrf.mxu0 }
 0x21e   : > { %1597 = vmatmul.mubr.msk.f32.gmra.mxu0 %vm972_vm0, %v929_v61  ;;  %1598 = vmatmul.mubr.msk.f32.vlgmr.msra.gmra.mxu1 %vm972_vm0, %v930_v63  ;;  %v870_v2 = vadd.f32 %v2364_v52, %v869_v0  ;;  %v933_v7 = vmax.f32 %v875_v4, 0.0 }
 0x21f   : > { %1103 = vmatprep.mubr.f32.mxu1 %v2050_v50  ;;  %v1778_v3 = vpop.f32.mrf.mxu0 }
 0x220   : > { %v932_v5 = vmax.f32 %v870_v2, 0.0  ;;  %v885_v10 = vadd.f32 %v1778_v3, %v2364_v52 }
 0x221   : > { %v879_v6 = vpop.f32.mrf.mxu0 }
 0x222   : > { %1599 = vmatmul.mubr.msk.f32.gmra.mxu1 %vm972_vm0, %v931_v1  ;;  %v880_v8 = vadd.f32 %v2364_v52, %v879_v6  ;;  %v935_v13 = vmax.f32 %v885_v10, 0.0 }
 0x223   : > { %1109 = vmatprep.mubr.f32.mxu1 %v2050_v50  ;;  %v1781_v9 = vpop.f32.mrf.mxu0 }
 0x224   : > { %v934_v11 = vmax.f32 %v880_v8, 0.0  ;;  %v895_v16 = vadd.f32 %v1781_v9, %v2364_v52 }
 0x225   : > { %v889_v12 = vpop.f32.mrf.mxu0 }
 0x226   : > { %1600 = vmatmul.mubr.msk.f32.gmra.mxu1 %vm972_vm0, %v932_v5  ;;  %v890_v14 = vadd.f32 %v2364_v52, %v889_v12  ;;  %v937_v19 = vmax.f32 %v895_v16, 0.0 }
 0x227   : > { %1115 = vmatprep.mubr.f32.mxu1 %v2050_v50  ;;  %v1784_v15 = vpop.f32.mrf.mxu0 }
 0x228   : > { %v936_v17 = vmax.f32 %v890_v14, 0.0  ;;  %v905_v22 = vadd.f32 %v1784_v15, %v2364_v52  ;;  %v964_v15 = vsub.s32 0, %v963_v37 }
 0x229   : > { %v899_v18 = vpop.f32.mrf.mxu0 }
 0x22a   : > { %1601 = vmatmul.mubr.msk.f32.gmra.mxu1 %vm972_vm0, %v933_v7  ;;  %v900_v20 = vadd.f32 %v2364_v52, %v899_v18  ;;  %v939_v25 = vmax.f32 %v905_v22, 0.0 }
 0x22b   : > { %1121 = vmatprep.mubr.f32.mxu1 %v2050_v50  ;;  %v1787_v21 = vpop.f32.mrf.mxu0 }
 0x22c   : > { %v938_v23 = vmax.f32 %v900_v20, 0.0  ;;  %v915_v28 = vadd.f32 %v1787_v21, %v2364_v52 }
 0x22d   : > { %v909_v24 = vpop.f32.mrf.mxu0 }
 0x22e   : > { %1602 = vmatmul.mubr.msk.f32.gmra.mxu1 %vm972_vm0, %v934_v11  ;;  %v910_v26 = vadd.f32 %v2364_v52, %v909_v24  ;;  %v941_v31 = vmax.f32 %v915_v28, 0.0 }
 0x22f   : > { %1127 = vmatprep.mubr.f32.mxu1 %v2050_v50  ;;  %v1790_v27 = vpop.f32.mrf.mxu0 }
 0x230   : > { %v940_v29 = vmax.f32 %v910_v26, 0.0  ;;  %v925_v33 = vadd.f32 %v1790_v27, %v2364_v52 }
 0x231   : > { %v919_v30 = vpop.f32.mrf.mxu0 }
 0x232   : > { %1603 = vmatmul.mubr.msk.f32.gmra.mxu1 %vm972_vm0, %v935_v13  ;;  %v920_v32 = vadd.f32 %v2364_v52, %v919_v30  ;;  %v943_v35 = vmax.f32 %v925_v33, 0.0 }
 0x233   : > { %1133 = vmatprep.mubr.f32.mxu1 %v2050_v50 }
 0x234   : > { %v942_v34 = vmax.f32 %v920_v32, 0.0 }
 0x236   : > { %1604 = vmatmul.mubr.msk.f32.gmra.mxu1 %vm972_vm0, %v936_v17 }
 0x237   : > { %1139 = vmatprep.mubr.f32.mxu1 %v2050_v50 }
 0x23a   : > { %1605 = vmatmul.mubr.msk.f32.gmra.mxu1 %vm972_vm0, %v937_v19  ;;  %v965_v19 = vrot.slane %v960_v40, %v964_v15 }
 0x23b   : > { %1145 = vmatprep.mubr.f32.mxu1 %v2050_v50 }
 0x23e   : > { %1606 = vmatmul.mubr.msk.f32.gmra.mxu1 %vm972_vm0, %v938_v23 }
 0x23f   : > { %1151 = vmatprep.mubr.f32.mxu1 %v2050_v50 }
 0x242   : > { %1607 = vmatmul.mubr.msk.f32.gmra.mxu1 %vm972_vm0, %v939_v25 }
 0x243   : > { %1157 = vmatprep.mubr.f32.mxu1 %v2050_v50 }
 0x246   : > { %1608 = vmatmul.mubr.msk.f32.gmra.mxu1 %vm972_vm0, %v940_v29 }
 0x247   : > { %1163 = vmatprep.mubr.f32.mxu1 %v2050_v50 }
 0x24a   : > { %1609 = vmatmul.mubr.msk.f32.gmra.mxu1 %vm972_vm0, %v941_v31 }
 0x24b   : > { %1169 = vmatprep.mubr.f32.mxu1 %v2050_v50 }
 0x24e   : > { %1610 = vmatmul.mubr.msk.f32.gmra.mxu1 %vm972_vm0, %v942_v34 }
 0x24f   : > { %1175 = vmatprep.mubr.f32.mxu1 %v2050_v50 }
 0x252   : > { %1611 = vmatmul.mubr.msk.f32.gmra.mxu1 %vm972_vm0, %v943_v35 }
 0x2da   : > { %v1087_v42 = vpop.f32.mrf.mxu0 }
 0x2db   : > { %v2473_v23 = vadd.f32 %v1087_v42, %v965_v19 }
 0x2dc   : > { %v1089_v43 = vpop.f32.mrf.mxu0 }
 0x2dd   : > { %v2418_v44 = vadd.f32 %v1089_v43, %v2415_v41  ;;  %v1182_v30 = vmul.f32 %v2473_v23, %v2473_v23 }
 0x2de   : > { %v1093_v45 = vpop.f32.mrf.mxu0  ;;  %v1099_v38 = vpop.f32.mrf.mxu1 }
 0x2df   : > { %1294 = vmax.xlane.f32.xlu0 %v2418_v44  ;;  %v2479_v27 = vadd.f32 %v1093_v45, %v965_v19  ;;  %v2481_v28 = vadd.f32 %v1099_v38, %v965_v19 }
 0x2e0   : > { %v1095_v46 = vpop.f32.mrf.mxu0  ;;  %v1101_v47 = vpop.f32.mrf.mxu1 }
 0x2e1   : > { %v2422_v48 = vadd.f32 %v1095_v46, %v2415_v41  ;;  %v2425_v49 = vadd.f32 %v1101_v47, %v2415_v41  ;;  %v1183_v33 = vmul.f32 %v2479_v27, %v2479_v27  ;;  %v1184_v34 = vmul.f32 %v2481_v28, %v2481_v28 }
 0x2e2   : > { %v1105_v50 = vpop.f32.mrf.mxu1 }
 0x2e3   : > { %1298 = vmax.xlane.f32.xlu1 %v2425_v49  ;;  %1296 = vmax.xlane.f32.xlu0 %v2422_v48  ;;  %v2489_v31 = vadd.f32 %v1105_v50, %v965_v19 }
 0x2e4   : > { %v1107_v51 = vpop.f32.mrf.mxu1 }
 0x2e5   : > { %v2430_v52 = vadd.f32 %v1107_v51, %v2415_v41  ;;  %v1185_v37 = vmul.f32 %v2489_v31, %v2489_v31 }
 0x2e6   : > { %v1111_v53 = vpop.f32.mrf.mxu1 }
 0x2e7   : > { %1300 = vmax.xlane.f32.xlu1 %v2430_v52  ;;  %v2491_v32 = vadd.f32 %v1111_v53, %v965_v19 }
 0x2e8   : > { %v1113_v54 = vpop.f32.mrf.mxu1 }
 0x2e9   : > { %v2434_v55 = vadd.f32 %v1113_v54, %v2415_v41  ;;  %v1186_v39 = vmul.f32 %v2491_v32, %v2491_v32 }
 0x2ea   : > { %v1117_v56 = vpop.f32.mrf.mxu1 }
 0x2eb   : > { %1302 = vmax.xlane.f32.xlu0 %v2434_v55  ;;  %v2497_v35 = vadd.f32 %v1117_v56, %v965_v19 }
 0x2ec   : > { %v1119_v57 = vpop.f32.mrf.mxu1 }
 0x2ed   : > { %v2438_v58 = vadd.f32 %v1119_v57, %v2415_v41  ;;  %v1187_v42 = vmul.f32 %v2497_v35, %v2497_v35 }
 0x2ee   : > { %v1123_v59 = vpop.f32.mrf.mxu1 }
 0x2ef   : > { %1304 = vmax.xlane.f32.xlu1 %v2438_v58  ;;  %v2499_v36 = vadd.f32 %v1123_v59, %v965_v19 }
 0x2f0   : > { %v1125_v60 = vpop.f32.mrf.mxu1 }
 0x2f1   : > { %v2442_v61 = vadd.f32 %v1125_v60, %v2415_v41  ;;  %v1188_v43 = vmul.f32 %v2499_v36, %v2499_v36 }
 0x2f2   : > { %v1129_v62 = vpop.f32.mrf.mxu1 }
 0x2f3   : > { %1306 = vmax.xlane.f32.xlu0 %v2442_v61  ;;  %v2505_v40 = vadd.f32 %v1129_v62, %v965_v19 }
 0x2f4   : > { %v1131_v63 = vpop.f32.mrf.mxu1 }
 0x2f5   : > { %v2446_v0 = vadd.f32 %v1131_v63, %v2415_v41  ;;  %v1189_v46 = vmul.f32 %v2505_v40, %v2505_v40 }
 0x2f6   : > { %v1135_v1 = vpop.f32.mrf.mxu1 }
 0x2f7   : > { %1308 = vmax.xlane.f32.xlu1 %v2446_v0 }
 0x2f8   : > { %v1137_v2 = vpop.f32.mrf.mxu1 }
 0x2f9   : > { %v2450_v3 = vadd.f32 %v1137_v2, %v2415_v41 }
 0x2fa   : > { %v1141_v4 = vpop.f32.mrf.mxu1 }
 0x2fb   : > { %1310 = vmax.xlane.f32.xlu0 %v2450_v3  ;;  %v2513_v45 = vadd.f32 %v1141_v4, %v965_v19 }
 0x2fc   : > { %v1143_v5 = vpop.f32.mrf.mxu1 }
 0x2fd   : > { %v2454_v6 = vadd.f32 %v1143_v5, %v2415_v41  ;;  %v1191_v53 = vmul.f32 %v2513_v45, %v2513_v45 }
 0x2fe   : > { %v1147_v7 = vpop.f32.mrf.mxu1 }
 0x2ff   : > { %1312 = vmax.xlane.f32.xlu1 %v2454_v6  ;;  %v2515_v38 = vadd.f32 %v1147_v7, %v965_v19 }
 0x300   : > { %v1149_v8 = vpop.f32.mrf.mxu1 }
 0x301   : > { %v2458_v9 = vadd.f32 %v1149_v8, %v2415_v41  ;;  %v1192_v54 = vmul.f32 %v2515_v38, %v2515_v38 }
 0x302   : > { %v1153_v10 = vpop.f32.mrf.mxu1 }
 0x303   : > { %1314 = vmax.xlane.f32.xlu0 %v2458_v9  ;;  %v2521_v50 = vadd.f32 %v1153_v10, %v965_v19 }
 0x304   : > { %v1155_v11 = vpop.f32.mrf.mxu1 }
 0x305   : > { %v2462_v12 = vadd.f32 %v1155_v11, %v2415_v41  ;;  %v1193_v59 = vmul.f32 %v2521_v50, %v2521_v50 }
 0x306   : > { %v1159_v13 = vpop.f32.mrf.mxu1 }
 0x307   : > { %1316 = vmax.xlane.f32.xlu1 %v2462_v12  ;;  %v2523_v51 = vadd.f32 %v1159_v13, %v965_v19 }
 0x308   : > { %v1161_v14 = vpop.f32.mrf.mxu1 }
 0x309   : > { %v2466_v16 = vadd.f32 %v1161_v14, %v2415_v41  ;;  %v1194_v60 = vmul.f32 %v2523_v51, %v2523_v51 }
 0x30a   : > { %v1165_v17 = vpop.f32.mrf.mxu1 }
 0x30b   : > { %1318 = vmax.xlane.f32.xlu0 %v2466_v16  ;;  %v2529_v56 = vadd.f32 %v1165_v17, %v965_v19 }
 0x30c   : > { %v1167_v18 = vpop.f32.mrf.mxu1 }
 0x30d   : > { %v2470_v20 = vadd.f32 %v1167_v18, %v2415_v41  ;;  %v1195_v63 = vmul.f32 %v2529_v56, %v2529_v56 }
 0x30e   : > { %v1171_v21 = vpop.f32.mrf.mxu1 }
 0x30f   : > { %1320 = vmax.xlane.f32.xlu1 %v2470_v20  ;;  %v2531_v57 = vadd.f32 %v1171_v21, %v965_v19 }
 0x310   : > { %v1173_v22 = vpop.f32.mrf.mxu1 }
 0x311   : > { %v2476_v24 = vadd.f32 %v1173_v22, %v2415_v41 }
 0x312   : > { %v1177_v25 = vpop.f32.mrf.mxu1 }
 0x313   : > { %1322 = vmax.xlane.f32.xlu0 %v2476_v24  ;;  %v2537_v62 = vadd.f32 %v1177_v25, %v965_v19 }
 0x314   : > { %v1179_v26 = vpop.f32.mrf.mxu1 }
 0x315   : > { %v2484_v29 = vadd.f32 %v1179_v26, %v2415_v41  ;;  %v2507_v41 = vadd.f32 %v1135_v1, %v965_v19  ;;  %v1196_v1 = vmul.f32 %v2531_v57, %v2531_v57  ;;  %v1197_v2 = vmul.f32 %v2537_v62, %v2537_v62 }
 0x317   : > { %1324 = vmax.xlane.f32.xlu1 %v2484_v29  ;;  %1198 = vadd.xlane.f32.xlu0 %v1182_v30  ;;  %v1190_v47 = vmul.f32 %v2507_v41, %v2507_v41 }
 0x31b   : > { %1200 = vadd.xlane.f32.xlu1 %v1183_v33  ;;  %1202 = vadd.xlane.f32.xlu0 %v1184_v34 }
 0x31f   : > { %1204 = vadd.xlane.f32.xlu1 %v1185_v37  ;;  %1206 = vadd.xlane.f32.xlu0 %v1186_v39 }
 0x323   : > { %1208 = vadd.xlane.f32.xlu1 %v1187_v42  ;;  %1210 = vadd.xlane.f32.xlu0 %v1188_v43 }
 0x327   : > { %1212 = vadd.xlane.f32.xlu1 %v1189_v46  ;;  %1214 = vadd.xlane.f32.xlu0 %v1190_v47 }
 0x32b   : > { %1216 = vadd.xlane.f32.xlu1 %v1191_v53  ;;  %1218 = vadd.xlane.f32.xlu0 %v1192_v54 }
 0x32f   : > { %1220 = vadd.xlane.f32.xlu1 %v1193_v59  ;;  %1222 = vadd.xlane.f32.xlu0 %v1194_v60 }
 0x333   : > { %1224 = vadd.xlane.f32.xlu1 %v1195_v63  ;;  %1226 = vadd.xlane.f32.xlu0 %v1196_v1 }
 0x337   : > { %1228 = vadd.xlane.f32.xlu1 %v1197_v2 }
 0x368   : > { %v1295_v4 = vpop.xlane.xlu0 %1294 }
 0x369   : > { %v1326_v5 = vsub.f32 %v2418_v44, %v1295_v4 }
 0x36b   : > { %v1342_v7 = vmul.f32 1.442695, %v1326_v5 }
 0x36c   : > { %v1299_v8 = vpop.xlane.xlu1 %1298  ;;  %v1297_v10 = vpop.xlane.xlu0 %1296 }
 0x36d   : > { %1897 = vpow2.f32 %v1342_v7  ;;  %v1328_v11 = vsub.f32 %v2425_v49, %v1299_v8  ;;  %v1327_v13 = vsub.f32 %v2422_v48, %v1297_v10 }
 0x36f   : > { %v1346_v14 = vmul.f32 1.442695, %v1328_v11  ;;  %v1344_v15 = vmul.f32 1.442695, %v1327_v13 }
 0x370   : > { %v1301_v17 = vpop.xlane.xlu1 %1300 }
 0x371   : > { %1899 = vpow2.f32 %v1346_v14  ;;  %v1329_v18 = vsub.f32 %v2430_v52, %v1301_v17 }
 0x372   : > { %1901 = vpow2.f32 %v1344_v15 }
 0x373   : > { %v1348_v19 = vmul.f32 1.442695, %v1329_v18 }
 0x374   : > { %v1303_v21 = vpop.xlane.xlu0 %1302 }
 0x375   : > { %1903 = vpow2.f32 %v1348_v19  ;;  %v1330_v44 = vsub.f32 %v2434_v55, %v1303_v21 }
 0x377   : > { %v1350_v22 = vmul.f32 1.442695, %v1330_v44 }
 0x378   : > { %v1305_v25 = vpop.xlane.xlu1 %1304 }
 0x379   : > { %1905 = vpow2.f32 %v1350_v22  ;;  %v1331_v26 = vsub.f32 %v2438_v58, %v1305_v25 }
 0x37a   : > { %v2551_v49 = vpop.eup %1897 }
 0x37b   : > { %v1352_v48 = vmul.f32 1.442695, %v1331_v26  ;;  %1374 = vadd.xlane.f32.xlu0 %v2551_v49 }
 0x37c   : > { %v1307_v30 = vpop.xlane.xlu0 %1306 }
 0x37d   : > { %1907 = vpow2.f32 %v1352_v48  ;;  %v1332_v52 = vsub.f32 %v2442_v61, %v1307_v30 }
 0x37e   : > { %v2555_v33 = vpop.eup %1899 }
 0x37f   : > { %v2557_v34 = vpop.eup %1901  ;;  %v1354_v37 = vmul.f32 1.442695, %v1332_v52  ;;  %1378 = vadd.xlane.f32.xlu0 %v2555_v33 }
 0x380   : > { %1376 = vadd.xlane.f32.xlu1 %v2557_v34  ;;  %v1309_v55 = vpop.xlane.xlu1 %1308 }
 0x381   : > { %1909 = vpow2.f32 %v1354_v37  ;;  %v1333_v58 = vsub.f32 %v2446_v0, %v1309_v55 }
 0x382   : > { %v2562_v39 = vpop.eup %1903 }
 0x383   : > { %v1356_v42 = vmul.f32 1.442695, %v1333_v58 }
 0x384   : > { %1380 = vadd.xlane.f32.xlu1 %v2562_v39  ;;  %v1311_v43 = vpop.xlane.xlu0 %1310 }
 0x385   : > { %1911 = vpow2.f32 %v1356_v42  ;;  %v1334_v61 = vsub.f32 %v2450_v3, %v1311_v43 }
 0x386   : > { %v2566_v46 = vpop.eup %1905 }
 0x387   : > { %v1358_v47 = vmul.f32 1.442695, %v1334_v61  ;;  %1382 = vadd.xlane.f32.xlu0 %v2566_v46 }
 0x388   : > { %v1313_v53 = vpop.xlane.xlu1 %1312 }
 0x389   : > { %1913 = vpow2.f32 %v1358_v47  ;;  %v1335_v54 = vsub.f32 %v2454_v6, %v1313_v53 }
 0x38a   : > { %v2570_v59 = vpop.eup %1907 }
 0x38b   : > { %v1360_v0 = vmul.f32 1.442695, %v1335_v54  ;;  %1384 = vadd.xlane.f32.xlu1 %v2570_v59 }
 0x38c   : > { %v1315_v60 = vpop.xlane.xlu0 %1314 }
 0x38d   : > { %1915 = vpow2.f32 %v1360_v0  ;;  %v1336_v63 = vsub.f32 %v2458_v9, %v1315_v60 }
 0x38e   : > { %v2574_v1 = vpop.eup %1909 }
 0x38f   : > { %v1362_v3 = vmul.f32 1.442695, %v1336_v63  ;;  %1386 = vadd.xlane.f32.xlu0 %v2574_v1 }
 0x390   : > { %v1317_v2 = vpop.xlane.xlu1 %1316 }
 0x391   : > { %1917 = vpow2.f32 %v1362_v3  ;;  %v1337_v4 = vsub.f32 %v2462_v12, %v1317_v2 }
 0x392   : > { %v2578_v5 = vpop.eup %1911 }
 0x393   : > { %v1364_v6 = vmul.f32 1.442695, %v1337_v4  ;;  %1388 = vadd.xlane.f32.xlu1 %v2578_v5 }
 0x394   : > { %v1319_v7 = vpop.xlane.xlu0 %1318 }
 0x395   : > { %1919 = vpow2.f32 %v1364_v6  ;;  %v1338_v8 = vsub.f32 %v2466_v16, %v1319_v7 }
 0x396   : > { %v2582_v10 = vpop.eup %1913 }
 0x397   : > { %v1366_v9 = vmul.f32 1.442695, %v1338_v8  ;;  %1390 = vadd.xlane.f32.xlu0 %v2582_v10 }
 0x398   : > { %v1321_v11 = vpop.xlane.xlu1 %1320 }
 0x399   : > { %1921 = vpow2.f32 %v1366_v9  ;;  %v1339_v13 = vsub.f32 %v2470_v20, %v1321_v11 }
 0x39a   : > { %v2586_v14 = vpop.eup %1915 }
 0x39b   : > { %v1368_v12 = vmul.f32 1.442695, %v1339_v13  ;;  %1392 = vadd.xlane.f32.xlu1 %v2586_v14 }
 0x39c   : > { %v1323_v15 = vpop.xlane.xlu0 %1322 }
 0x39d   : > { %1923 = vpow2.f32 %v1368_v12  ;;  %v1340_v17 = vsub.f32 %v2476_v24, %v1323_v15 }
 0x39e   : > { %v2590_v18 = vpop.eup %1917 }
 0x39f   : > { %v1370_v16 = vmul.f32 1.442695, %v1340_v17  ;;  %1394 = vadd.xlane.f32.xlu0 %v2590_v18 }
 0x3a0   : > { %v1325_v19 = vpop.xlane.xlu1 %1324  ;;  %v1199_v21 = vpop.xlane.xlu0 %1198 }
 0x3a1   : > { %1925 = vpow2.f32 %v1370_v16  ;;  %v1341_v44 = vsub.f32 %v2484_v29, %v1325_v19  ;;  %v1230_v20 = vmax.f32 %v1199_v21, 1e-24 }
 0x3a2   : > { %v2594_v22 = vpop.eup %1919 }
 0x3a3   : > { %v1372_v25 = vmul.f32 1.442695, %v1341_v44  ;;  %1927 = vrsqrt.f32 %v1230_v20  ;;  %1396 = vadd.xlane.f32.xlu1 %v2594_v22 }
 0x3a4   : > { %v1201_v26 = vpop.xlane.xlu1 %1200  ;;  %v1203_v48 = vpop.xlane.xlu0 %1202 }
 0x3a5   : > { %1929 = vpow2.f32 %v1372_v25  ;;  %v1231_v24 = vmax.f32 %v1201_v26, 1e-24  ;;  %v1232_v30 = vmax.f32 %v1203_v48, 1e-24 }
 0x3a6   : > { %v2597_v52 = vpop.eup %1921 }
 0x3a7   : > { %1931 = vrsqrt.f32 %v1231_v24  ;;  %1398 = vadd.xlane.f32.xlu0 %v2597_v52 }
 0x3a8   : > { %1933 = vrsqrt.f32 %v1232_v30  ;;  %v1205_v37 = vpop.xlane.xlu1 %1204  ;;  %v1207_v29 = vpop.xlane.xlu0 %1206 }
 0x3a9   : > { %v1233_v55 = vmax.f32 %v1205_v37, 1e-24  ;;  %v1234_v58 = vmax.f32 %v1207_v29, 1e-24 }
 0x3aa   : > { %v2600_v42 = vpop.eup %1923 }
 0x3ab   : > { %1935 = vrsqrt.f32 %v1233_v55  ;;  %1400 = vadd.xlane.f32.xlu1 %v2600_v42 }
 0x3ac   : > { %1937 = vrsqrt.f32 %v1234_v58  ;;  %v1209_v43 = vpop.xlane.xlu1 %1208  ;;  %v1211_v61 = vpop.xlane.xlu0 %1210 }
 0x3ad   : > { %v1235_v47 = vmax.f32 %v1209_v43, 1e-24  ;;  %v1236_v53 = vmax.f32 %v1211_v61, 1e-24 }
 0x3ae   : > { %v2603_v54 = vpop.eup %1925 }
 0x3af   : > { %1939 = vrsqrt.f32 %v1235_v47  ;;  %1402 = vadd.xlane.f32.xlu0 %v2603_v54 }
 0x3b0   : > { %v1928_v0 = vpop.eup %1927  ;;  %1941 = vrsqrt.f32 %v1236_v53  ;;  %v1213_v60 = vpop.xlane.xlu1 %1212 }
 0x3b1   : > { %v1215_v63 = vpop.xlane.xlu0 %1214  ;;  %v1262_v3 = vmul.f32 %v1928_v0, %v2473_v23  ;;  %v1237_v2 = vmax.f32 %v1213_v60, 1e-24 }
 0x3b2   : > { %v1238_v4 = vmax.f32 %v1215_v63, 1e-24  ;;  %v2607_v6 = vpop.eup %1929 }
 0x3b3   : > { %1278 = vst [vmem:[%s2187_s14] sm:$0xff] %v1262_v3  ;;  %1943 = vrsqrt.f32 %v1237_v2  ;;  %1404 = vadd.xlane.f32.xlu1 %v2607_v6 }
 0x3b4   : > { %v1932_v7 = vpop.eup %1931  ;;  %1945 = vrsqrt.f32 %v1238_v4  ;;  %v1217_v8 = vpop.xlane.xlu1 %1216 }
 0x3b5   : > { %v1219_v9 = vpop.xlane.xlu0 %1218  ;;  %v1934_v11 = vpop.eup %1933  ;;  %v1263_v13 = vmul.f32 %v1932_v7, %v2479_v27  ;;  %v1239_v12 = vmax.f32 %v1217_v8, 1e-24 }
 0x3b6   : > { %v1240_v23 = vmax.f32 %v1219_v9, 1e-24  ;;  %v1264_v15 = vmul.f32 %v1934_v11, %v2481_v28 }
 0x3b7   : > { %1279 = vst [vmem:[%s2187_s14 + $0x8] sm:$0xff] %v1263_v13  ;;  %1947 = vrsqrt.f32 %v1239_v12 }
 0x3b8   : > { %v1936_v17 = vpop.eup %1935  ;;  %1280 = vst [vmem:[%s2187_s14 + $0x10] sm:$0xff] %v1264_v15  ;;  %1949 = vrsqrt.f32 %v1240_v23  ;;  %v1221_v16 = vpop.xlane.xlu1 %1220 }
 0x3b9   : > { %v1223_v19 = vpop.xlane.xlu0 %1222  ;;  %v1938_v21 = vpop.eup %1937  ;;  %v1265_v44 = vmul.f32 %v1936_v17, %v2489_v31  ;;  %v1241_v20 = vmax.f32 %v1221_v16, 1e-24 }
 0x3ba   : > { %v1242_v25 = vmax.f32 %v1223_v19, 1e-24  ;;  %v1266_v27 = vmul.f32 %v1938_v21, %v2491_v32 }
 0x3bb   : > { %1281 = vst [vmem:[%s2187_s14 + $0x18] sm:$0xff] %v1265_v44  ;;  %1951 = vrsqrt.f32 %v1241_v20 }
 0x3bc   : > { %v1940_v28 = vpop.eup %1939  ;;  %1282 = vst [vmem:[%s2187_s14 + $0x20] sm:$0xff] %v1266_v27  ;;  %1953 = vrsqrt.f32 %v1242_v25  ;;  %v1225_v26 = vpop.xlane.xlu1 %1224 }
 0x3bd   : > { %v1227_v48 = vpop.xlane.xlu0 %1226  ;;  %v1942_v24 = vpop.eup %1941  ;;  %v1267_v30 = vmul.f32 %v1940_v28, %v2497_v35  ;;  %v1243_v37 = vmax.f32 %v1225_v26, 1e-24 }
 0x3be   : > { %v1244_v31 = vmax.f32 %v1227_v48, 1e-24  ;;  %v1268_v29 = vmul.f32 %v1942_v24, %v2499_v36 }
 0x3bf   : > { %1283 = vst [vmem:[%s2187_s14 + $0x28] sm:$0xff] %v1267_v30  ;;  %1955 = vrsqrt.f32 %v1243_v37 }
 0x3c0   : > { %v1944_v32 = vpop.eup %1943  ;;  %1284 = vst [vmem:[%s2187_s14 + $0x30] sm:$0xff] %v1268_v29  ;;  %1957 = vrsqrt.f32 %v1244_v31  ;;  %v1229_v55 = vpop.xlane.xlu1 %1228 }
 0x3c1   : > { %v1946_v58 = vpop.eup %1945  ;;  %v1269_v43 = vmul.f32 %v1944_v32, %v2505_v40  ;;  %v1245_v61 = vmax.f32 %v1229_v55, 1e-24 }
 0x3c2   : > { %v1270_v35 = vmul.f32 %v1946_v58, %v2507_v41 }
 0x3c3   : > { %1285 = vst [vmem:[%s2187_s14 + $0x38] sm:$0xff] %v1269_v43  ;;  %1959 = vrsqrt.f32 %v1245_v61 }
 0x3c4   : > { %v1948_v47 = vpop.eup %1947  ;;  %1286 = vst [vmem:[%s2187_s14 + $0x40] sm:$0xff] %v1270_v35 }
 0x3c5   : > { %v1950_v36 = vpop.eup %1949  ;;  %v1271_v53 = vmul.f32 %v1948_v47, %v2513_v45 }
 0x3c6   : > { %v1272_v0 = vmul.f32 %v1950_v36, %v2515_v38 }
 0x3c7   : > { %1287 = vst [vmem:[%s2187_s14 + $0x48] sm:$0xff] %v1271_v53 }
 0x3c8   : > { %v1952_v60 = vpop.eup %1951  ;;  %1288 = vst [vmem:[%s2187_s14 + $0x50] sm:$0xff] %v1272_v0 }
 0x3c9   : > { %v1954_v40 = vpop.eup %1953  ;;  %v1273_v63 = vmul.f32 %v1952_v60, %v2521_v50 }
 0x3ca   : > { %v1274_v41 = vmul.f32 %v1954_v40, %v2523_v51 }
 0x3cb   : > { %1289 = vst [vmem:[%s2187_s14 + $0x58] sm:$0xff] %v1273_v63 }
 0x3cc   : > { %v1956_v3 = vpop.eup %1955  ;;  %1290 = vst [vmem:[%s2187_s14 + $0x60] sm:$0xff] %v1274_v41 }
 0x3cd   : > { %v1958_v2 = vpop.eup %1957  ;;  %v1275_v4 = vmul.f32 %v1956_v3, %v2529_v56 }
 0x3ce   : > { %v1276_v45 = vmul.f32 %v1958_v2, %v2531_v57 }
 0x3cf   : > { %1291 = vst [vmem:[%s2187_s14 + $0x68] sm:$0xff] %v1275_v4 }
 0x3d0   : > { %v1960_v7 = vpop.eup %1959  ;;  %1292 = vst [vmem:[%s2187_s14 + $0x70] sm:$0xff] %v1276_v45 }
 0x3d1   : > { %v1277_v38 = vmul.f32 %v1960_v7, %v2537_v62 }
 0x3d3   : > { %1293 = vst [vmem:[%s2187_s14 + $0x78] sm:$0xff] %v1277_v38 }
 0x404   : > { %v1375_v8 = vpop.xlane.xlu0 %1374 }
 0x405   : > { %1961 = vrcp.f32 %v1375_v8 }
 0x408   : > { %v1379_v50 = vpop.xlane.xlu0 %1378 }
 0x409   : > { %v1377_v9 = vpop.xlane.xlu1 %1376  ;;  %1963 = vrcp.f32 %v1379_v50 }
 0x40a   : > { %1965 = vrcp.f32 %v1377_v9 }
 0x40d   : > { %v1381_v51 = vpop.xlane.xlu1 %1380 }
 0x40e   : > { %1967 = vrcp.f32 %v1381_v51 }
 0x410   : > { %v1383_v56 = vpop.xlane.xlu0 %1382 }
 0x411   : > { %1969 = vrcp.f32 %v1383_v56 }
 0x412   : > { %v1962_v57 = vpop.eup %1961 }
 0x413   : > { %v1422_v11 = vmul.f32 %v1962_v57, %v2551_v49 }
 0x414   : > { %v1385_v13 = vpop.xlane.xlu1 %1384 }
 0x415   : > { %1438 = vst [vmem:[%s2192_s15] sm:$0xff] %v1422_v11  ;;  %1971 = vrcp.f32 %v1385_v13 }
 0x416   : > { %v1964_v62 = vpop.eup %1963 }
 0x417   : > { %v1966_v12 = vpop.eup %1965  ;;  %v1424_v23 = vmul.f32 %v1964_v62, %v2555_v33 }
 0x418   : > { %v1423_v15 = vmul.f32 %v1966_v12, %v2557_v34  ;;  %v1387_v17 = vpop.xlane.xlu0 %1386 }
 0x419   : > { %1440 = vst [vmem:[%s2192_s15 + $0x10] sm:$0xff] %v1424_v23  ;;  %1973 = vrcp.f32 %v1387_v17 }
 0x41a   : > { %1439 = vst [vmem:[%s2192_s15 + $0x8] sm:$0xff] %v1423_v15 }
 0x41b   : > { %v1968_v16 = vpop.eup %1967 }
 0x41c   : > { %v1425_v19 = vmul.f32 %v1968_v16, %v2562_v39  ;;  %v1389_v49 = vpop.xlane.xlu1 %1388 }
 0x41d   : > { %1975 = vrcp.f32 %v1389_v49 }
 0x41e   : > { %v1970_v21 = vpop.eup %1969  ;;  %1441 = vst [vmem:[%s2192_s15 + $0x18] sm:$0xff] %v1425_v19 }
 0x41f   : > { %v1426_v44 = vmul.f32 %v1970_v21, %v2566_v46 }
 0x420   : > { %v1391_v20 = vpop.xlane.xlu0 %1390 }
 0x421   : > { %1442 = vst [vmem:[%s2192_s15 + $0x20] sm:$0xff] %v1426_v44  ;;  %1977 = vrcp.f32 %v1391_v20 }
 0x422   : > { %v1972_v33 = vpop.eup %1971 }
 0x423   : > { %v1427_v34 = vmul.f32 %v1972_v33, %v2570_v59 }
 0x424   : > { %v1393_v25 = vpop.xlane.xlu1 %1392 }
 0x425   : > { %1443 = vst [vmem:[%s2192_s15 + $0x28] sm:$0xff] %v1427_v34  ;;  %1979 = vrcp.f32 %v1393_v25 }
 0x426   : > { %v1974_v27 = vpop.eup %1973 }
 0x427   : > { %v1428_v39 = vmul.f32 %v1974_v27, %v2574_v1 }
 0x428   : > { %v1395_v28 = vpop.xlane.xlu0 %1394 }
 0x429   : > { %1444 = vst [vmem:[%s2192_s15 + $0x30] sm:$0xff] %v1428_v39  ;;  %1981 = vrcp.f32 %v1395_v28 }
 0x42a   : > { %v1976_v26 = vpop.eup %1975 }
 0x42b   : > { %v1429_v46 = vmul.f32 %v1976_v26, %v2578_v5 }
 0x42c   : > { %v1397_v48 = vpop.xlane.xlu1 %1396 }
 0x42d   : > { %1445 = vst [vmem:[%s2192_s15 + $0x38] sm:$0xff] %v1429_v46  ;;  %1983 = vrcp.f32 %v1397_v48 }
 0x42e   : > { %v1978_v24 = vpop.eup %1977 }
 0x42f   : > { %v1430_v59 = vmul.f32 %v1978_v24, %v2582_v10 }
 0x430   : > { %v1399_v30 = vpop.xlane.xlu0 %1398 }
 0x431   : > { %1446 = vst [vmem:[%s2192_s15 + $0x40] sm:$0xff] %v1430_v59  ;;  %1985 = vrcp.f32 %v1399_v30 }
 0x432   : > { %v1980_v37 = vpop.eup %1979 }
 0x433   : > { %v1431_v1 = vmul.f32 %v1980_v37, %v2586_v14 }
 0x434   : > { %v1401_v31 = vpop.xlane.xlu1 %1400 }
 0x435   : > { %1447 = vst [vmem:[%s2192_s15 + $0x48] sm:$0xff] %v1431_v1  ;;  %1987 = vrcp.f32 %v1401_v31 }
 0x436   : > { %v1982_v5 = vpop.eup %1981 }
 0x437   : > { %v1432_v29 = vmul.f32 %v1982_v5, %v2590_v18 }
 0x438   : > { %v1403_v32 = vpop.xlane.xlu0 %1402 }
 0x439   : > { %1448 = vst [vmem:[%s2192_s15 + $0x50] sm:$0xff] %v1432_v29  ;;  %1989 = vrcp.f32 %v1403_v32 }
 0x43a   : > { %v1984_v10 = vpop.eup %1983 }
 0x43b   : > { %v1433_v55 = vmul.f32 %v1984_v10, %v2594_v22 }
 0x43c   : > { %v1405_v58 = vpop.xlane.xlu1 %1404 }
 0x43d   : > { %1449 = vst [vmem:[%s2192_s15 + $0x58] sm:$0xff] %v1433_v55  ;;  %1991 = vrcp.f32 %v1405_v58 }
 0x43e   : > { %v1986_v14 = vpop.eup %1985 }
 0x43f   : > { %v1434_v43 = vmul.f32 %v1986_v14, %v2597_v52 }
 0x441   : > { %1450 = vst [vmem:[%s2192_s15 + $0x60] sm:$0xff] %v1434_v43 }
 0x442   : > { %v1988_v61 = vpop.eup %1987 }
 0x443   : > { %v1435_v35 = vmul.f32 %v1988_v61, %v2600_v42 }
 0x445   : > { %1451 = vst [vmem:[%s2192_s15 + $0x68] sm:$0xff] %v1435_v35 }
 0x446   : > { %v1990_v18 = vpop.eup %1989 }
 0x447   : > { %v1436_v47 = vmul.f32 %v1990_v18, %v2603_v54 }
 0x449   : > { %1452 = vst [vmem:[%s2192_s15 + $0x70] sm:$0xff] %v1436_v47 }
 0x44a   : > { %v1992_v36 = vpop.eup %1991 }
 0x44b   : > { %v1437_v53 = vmul.f32 %v1992_v36, %v2607_v6 }
 0x44d   : > { %1453 = vst [vmem:[%s2192_s15 + $0x78] sm:$0xff] %v1437_v53 }
 0x44e PF: > { %s19_s11 = sadd.s32 1, %s2047_s11   ;;  %s2705_s27 = smov %s2027_s28 }
 0x44f   : > { %p16_p0 = scmp.ge.s32.totalorder %s19_s11, 6   ;;  %s2706_s28 = smov %s2147_s18 }
 0x450   : > { %s2707_s29 = smov %s2039_s9  ;;  %s2708_s30 = smov %s2043_s10 }
 0x451   : > { %s2709_s9 = smov %s2712_s12  ;;  %s2710_s10 = smov %s2716_s13 }
 0x452   :  { %18 = sbr.rel (!%p16_p0) target bundleno = 6 (0x6), region = 144 }

</bundles_post_ra>
